<compile_context>
chip_gen: v5e
topology: v5e:2x2
jax: 0.10.0
libtpu: 0.0.40
codegen_flags: <defaults>
</compile_context>

<pallas_src>
import functools

import jax
import jax.numpy as jnp
from jax.experimental import pallas as pl
from jax.experimental.pallas import tpu as pltpu


def _round_up(x, m):
    return ((x + m - 1) // m) * m


# ---------------------------------------------------------------------------
# Pallas kernel: fused im2col-matmul -> BatchNorm (batch stats) -> LeakyReLU
# ---------------------------------------------------------------------------
def _conv_bn_lrelu_kernel(p_ref, w_ref, o_ref, sum_ref, ssq_ref, stat_ref, *,
                          inv_m, eps=1e-5, slope=0.01):
    # grid = (2, n_m_tiles):
    #   axis 0 ("pass"): 0 = accumulate batch stats, 1 = normalize + activate
    #   axis 1: streams TM-row tiles of the im2col matrix
    p = pl.program_id(0)
    i = pl.program_id(1)

    @pl.when((p == 0) & (i == 0))
    def _init_stats():
        sum_ref[...] = jnp.zeros_like(sum_ref)
        ssq_ref[...] = jnp.zeros_like(ssq_ref)

    # bf16 MXU matmul with f32 accumulation. Conv bias is omitted: BN's mean
    # subtraction (beta = 0, gamma = 1 defaults) cancels any per-channel bias.
    acc = jnp.dot(p_ref[...], w_ref[...], preferred_element_type=jnp.float32)

    @pl.when(p == 0)
    def _accumulate():
        # Zero-padded rows/channels contribute 0 to both sums, so dividing by
        # the true M (inv_m) later gives exact biased batch statistics.
        sum_ref[...] += jnp.sum(acc, axis=0, keepdims=True)
        ssq_ref[...] += jnp.sum(acc * acc, axis=0, keepdims=True)
        o_ref[...] = acc                       # raw conv tile; overwritten in pass 1

    @pl.when((p == 1) & (i == 0))
    def _finalize_stats():
        mean = sum_ref[...] * inv_m
        var = ssq_ref[...] * inv_m - mean * mean
        stat_ref[0:1, :] = mean
        stat_ref[1:2, :] = jax.lax.rsqrt(var + eps)   # one rsqrt per channel

    @pl.when(p == 1)
    def _normalize():
        y = (acc - stat_ref[0:1, :]) * stat_ref[1:2, :]
        o_ref[...] = jnp.where(y >= 0.0, y, slope * y)


def _conv_bn_lrelu(patches, w_mat, *, tile_m=512):
    """patches: (M, K) f32, w_mat: (K, Cout) f32 -> (M, Cout) f32 (BN+LReLU applied)."""
    M, K = patches.shape
    Cout = w_mat.shape[1]

    K_pad = _round_up(K, 128)                 # lane-dense contraction dim
    C_pad = _round_up(Cout, 128)              # lane-dense output dim (unmasked vst)
    TM = min(tile_m, _round_up(M, 8))         # rows per streamed tile
    M_pad = _round_up(M, TM)
    n_tiles = M_pad // TM

    # Zero-pad and cast matmul inputs to bf16 (BN statistics stay f32 in-kernel).
    p = jnp.zeros((M_pad, K_pad), jnp.bfloat16).at[:M, :K].set(
        patches.astype(jnp.bfloat16))
    w = jnp.zeros((K_pad, C_pad), jnp.bfloat16).at[:K, :Cout].set(
        w_mat.astype(jnp.bfloat16))

    # VMEM budget: double-buffered patch + output tiles, resident weight, scratch.
    est = (2 * TM * K_pad * 2          # patch tiles (bf16, double-buffered)
           + 2 * K_pad * C_pad * 2     # weight (bf16), counted double-buffered
           + 2 * TM * C_pad * 4        # output tiles (f32, double-buffered)
           + 4 * 8 * C_pad * 4)        # stats scratch (padded)
    vmem_limit = int(min(max(4 * est, 8 * 1024 * 1024), 32 * 1024 * 1024))

    kernel = functools.partial(_conv_bn_lrelu_kernel, inv_m=float(1.0 / M))

    out = pl.pallas_call(
        kernel,
        out_shape=jax.ShapeDtypeStruct((M_pad, C_pad), jnp.float32),
        grid_spec=pltpu.PrefetchScalarGridSpec(
            num_scalar_prefetch=0,
            grid=(2, n_tiles),
            in_specs=[
                pl.BlockSpec((TM, K_pad), lambda p_, i: (i, 0)),     # streamed patches
                pl.BlockSpec((K_pad, C_pad), lambda p_, i: (0, 0)),  # resident weight
            ],
            out_specs=pl.BlockSpec((TM, C_pad), lambda p_, i: (i, 0)),
            scratch_shapes=[
                pltpu.VMEM((1, C_pad), jnp.float32),   # per-channel sum
                pltpu.VMEM((1, C_pad), jnp.float32),   # per-channel sum of squares
                pltpu.VMEM((2, C_pad), jnp.float32),   # [mean; rstd]
            ],
        ),
        compiler_params=pltpu.CompilerParams(
            # Both axes carry the cross-iteration stats scratch -> "arbitrary".
            dimension_semantics=("arbitrary", "arbitrary"),
            vmem_limit_bytes=vmem_limit,
        ),
    )(p, w)

    return out[:M, :Cout]


# ---------------------------------------------------------------------------
# Plain-JAX glue: im2col patch extraction (NHWC, zero padding, stride)
# ---------------------------------------------------------------------------
def _im2col(x_nhwc, k, stride):
    N, H, W, C = x_nhwc.shape
    pad = k // 2
    xp = jnp.pad(x_nhwc, ((0, 0), (pad, pad), (pad, pad), (0, 0)))
    Hout = (H + 2 * pad - k) // stride + 1
    Wout = (W + 2 * pad - k) // stride + 1
    cols = []
    for ky in range(k):
        for kx in range(k):
            patch = xp[:, ky:ky + stride * Hout:stride,
                          kx:kx + stride * Wout:stride, :]
            cols.append(patch)                        # (N, Hout, Wout, C)
    patches = jnp.stack(cols, axis=-2)                # (N, Hout, Wout, k*k, C)
    patches = patches.reshape(N * Hout * Wout, k * k * C)
    return patches, Hout, Wout


def _weight_to_matrix(w_oihw):
    # PyTorch weight (Cout, Cin, k, k) -> (k, k, Cin, Cout) -> (k*k*Cin, Cout)
    Cout, Cin, k, _ = w_oihw.shape
    return jnp.transpose(w_oihw, (2, 3, 1, 0)).reshape(k * k * Cin, Cout)


# ---------------------------------------------------------------------------
# discrim_block forward
# ---------------------------------------------------------------------------
def discrim_block_forward(x_nchw, params, kernel_size):
    # NCHW (PyTorch convention) -> NHWC for the kernel path
    x = jnp.transpose(x_nchw, (0, 2, 3, 1)).astype(jnp.float32)
    N = x.shape[0]

    # NOTE: conv biases are not applied — BatchNorm (training mode, beta=0)
    # subtracts the per-channel mean, which cancels any bias exactly.

    # --- block 1: conv stride 1 + BN + LeakyReLU ---
    p1, H1, W1 = _im2col(x, kernel_size, stride=1)
    y1 = _conv_bn_lrelu(p1, _weight_to_matrix(params["w1"]))
    C1 = params["w1"].shape[0]
    x1 = y1.reshape(N, H1, W1, C1)

    # --- block 2: conv stride 2 + BN + LeakyReLU ---
    p2, H2, W2 = _im2col(x1, kernel_size, stride=2)
    y2 = _conv_bn_lrelu(p2, _weight_to_matrix(params["w2"]))
    C2 = params["w2"].shape[0]
    x2 = y2.reshape(N, H2, W2, C2)

    # return NCHW to match PyTorch output convention
    return jnp.transpose(x2, (0, 3, 1, 2))


def init_params(key, in_feats, out_feats, kernel_size):
    k1, k2 = jax.random.split(key)
    # _conv init: weight ~ N(0, 0.02), bias = 0. BN gamma=1/beta=0 defaults folded
    # into the kernel; biases kept for interface fidelity but unused (BN cancels them).
    w1 = 0.02 * jax.random.normal(
        k1, (out_feats, in_feats, kernel_size, kernel_size), dtype=jnp.float32)
    w2 = 0.02 * jax.random.normal(
        k2, (out_feats, out_feats, kernel_size, kernel_size), dtype=jnp.float32)
    b1 = jnp.zeros((out_feats,), jnp.float32)
    b2 = jnp.zeros((out_feats,), jnp.float32)
    return {"w1": w1, "b1": b1, "w2": w2, "b2": b2}


if __name__ == "__main__":
    in_feats, out_feats, kernel_size = 4, 8, 3
    N, H, W = 2, 16, 16

    key = jax.random.PRNGKey(0)
    kx, kp = jax.random.split(key)
    x = jax.random.normal(kx, (N, in_feats, H, W), dtype=jnp.float32)  # NCHW like PyTorch
    params = init_params(kp, in_feats, out_feats, kernel_size)

    fwd = jax.jit(functools.partial(discrim_block_forward, kernel_size=kernel_size))
    out = fwd(x, params)
    out = jax.block_until_ready(out)

    assert out.shape == (N, out_feats, H // 2, W // 2), out.shape
    assert bool(jnp.all(jnp.isfinite(out)))
    print("KERNEL_OK")
</pallas_src>

<mosaic_0001>
module attributes {stable_mosaic.version = 11 : i64} {
  func.func @_conv_bn_lrelu_kernel(%arg0: i32, %arg1: i32, %arg2: memref<512x128xbf16, #tpu.memory_space<vmem>>, %arg3: memref<128x128xbf16, #tpu.memory_space<vmem>>, %arg4: memref<512x128xf32, #tpu.memory_space<vmem>>, %arg5: memref<1x128xf32, #tpu.memory_space<vmem>>, %arg6: memref<1x128xf32, #tpu.memory_space<vmem>>, %arg7: memref<2x128xf32, #tpu.memory_space<vmem>>) attributes {dimension_semantics = [#tpu.dimension_semantics<arbitrary>, #tpu.dimension_semantics<arbitrary>], iteration_bounds = array<i64: 2, 1>, scalar_prefetch = 0 : i64, scratch_operands = 3 : i64, tpu.core_type = #tpu.core_type<tc>, window_params = [{transform_indices = @transform_0, window_bounds = array<i64: 512, 128>}, {pipeline_mode = #tpu.pipeline_mode<synchronous>, transform_indices = @transform_1, window_bounds = array<i64: 128, 128>}, {transform_indices = @transform_2, window_bounds = array<i64: 512, 128>}]} {
    %c0_i32 = arith.constant 0 : i32
    %0 = arith.cmpi eq, %arg0, %c0_i32 : i32
    %c0_i32_0 = arith.constant 0 : i32
    %1 = arith.cmpi eq, %arg1, %c0_i32_0 : i32
    %2 = arith.andi %0, %1 : i1
    %3 = arith.extui %2 : i1 to i32
    %c0_i32_1 = arith.constant 0 : i32
    %4 = arith.cmpi ne, %3, %c0_i32_1 : i32
    scf.if %4 {
      %cst_11 = arith.constant 0.000000e+00 : f32
      %19 = vector.broadcast %cst_11 : f32 to vector<1x128xf32>
      %c0_12 = arith.constant 0 : index
      %c0_13 = arith.constant 0 : index
      %20 = vector.load %arg5[%c0_12, %c0_13] : memref<1x128xf32, #tpu.memory_space<vmem>>, vector<1x128xf32>
      tpu.vector_store %arg5[%c0_12, %c0_13], %19 {strides = array<i32>} : memref<1x128xf32, #tpu.memory_space<vmem>>, vector<1x128xf32>,
      %cst_14 = arith.constant 0.000000e+00 : f32
      %21 = vector.broadcast %cst_14 : f32 to vector<1x128xf32>
      %c0_15 = arith.constant 0 : index
      %c0_16 = arith.constant 0 : index
      %22 = vector.load %arg6[%c0_15, %c0_16] : memref<1x128xf32, #tpu.memory_space<vmem>>, vector<1x128xf32>
      tpu.vector_store %arg6[%c0_15, %c0_16], %21 {strides = array<i32>} : memref<1x128xf32, #tpu.memory_space<vmem>>, vector<1x128xf32>,
    } else {
    }
    %c0 = arith.constant 0 : index
    %c0_2 = arith.constant 0 : index
    %5 = vector.load %arg2[%c0, %c0_2] : memref<512x128xbf16, #tpu.memory_space<vmem>>, vector<512x128xbf16>
    %c0_3 = arith.constant 0 : index
    %c0_4 = arith.constant 0 : index
    %6 = vector.load %arg3[%c0_3, %c0_4] : memref<128x128xbf16, #tpu.memory_space<vmem>>, vector<128x128xbf16>
    %cst = arith.constant dense<0.000000e+00> : vector<512x128xf32>
    %7 = tpu.matmul %5, %6, %cst {dimension_numbers = #tpu.dot_dimension_numbers<[1], [0], [0], [1], [0, 0, 1, 1], [], []>} : vector<512x128xbf16>, vector<128x128xbf16>, vector<512x128xf32> -> vector<512x128xf32>
    %c0_i32_5 = arith.constant 0 : i32
    %8 = arith.cmpi eq, %arg0, %c0_i32_5 : i32
    %9 = arith.extui %8 : i1 to i32
    %c0_i32_6 = arith.constant 0 : i32
    %10 = arith.cmpi ne, %9, %c0_i32_6 : i32
    scf.if %10 {
      %c0_11 = arith.constant 0 : index
      %c0_12 = arith.constant 0 : index
      %19 = vector.load %arg5[%c0_11, %c0_12] : memref<1x128xf32, #tpu.memory_space<vmem>>, vector<1x128xf32>
      %cst_13 = arith.constant dense<0.000000e+00> : vector<128xf32>
      %20 = vector.multi_reduction <add>, %7, %cst_13 [0] : vector<512x128xf32> to vector<128xf32>
      %21 = vector.shape_cast %20 : vector<128xf32> to vector<1x128xf32>
      %22 = arith.addf %19, %21 : vector<1x128xf32>
      %c0_14 = arith.constant 0 : index
      %c0_15 = arith.constant 0 : index
      %23 = vector.load %arg5[%c0_14, %c0_15] : memref<1x128xf32, #tpu.memory_space<vmem>>, vector<1x128xf32>
      tpu.vector_store %arg5[%c0_14, %c0_15], %22 {strides = array<i32>} : memref<1x128xf32, #tpu.memory_space<vmem>>, vector<1x128xf32>,
      %c0_16 = arith.constant 0 : index
      %c0_17 = arith.constant 0 : index
      %24 = vector.load %arg6[%c0_16, %c0_17] : memref<1x128xf32, #tpu.memory_space<vmem>>, vector<1x128xf32>
      %25 = arith.mulf %7, %7 : vector<512x128xf32>
      %cst_18 = arith.constant dense<0.000000e+00> : vector<128xf32>
      %26 = vector.multi_reduction <add>, %25, %cst_18 [0] : vector<512x128xf32> to vector<128xf32>
      %27 = vector.shape_cast %26 : vector<128xf32> to vector<1x128xf32>
      %28 = arith.addf %24, %27 : vector<1x128xf32>
      %c0_19 = arith.constant 0 : index
      %c0_20 = arith.constant 0 : index
      %29 = vector.load %arg6[%c0_19, %c0_20] : memref<1x128xf32, #tpu.memory_space<vmem>>, vector<1x128xf32>
      tpu.vector_store %arg6[%c0_19, %c0_20], %28 {strides = array<i32>} : memref<1x128xf32, #tpu.memory_space<vmem>>, vector<1x128xf32>,
      %c0_21 = arith.constant 0 : index
      %c0_22 = arith.constant 0 : index
      %30 = vector.load %arg4[%c0_21, %c0_22] : memref<512x128xf32, #tpu.memory_space<vmem>>, vector<512x128xf32>
      tpu.vector_store %arg4[%c0_21, %c0_22], %7 {strides = array<i32>} : memref<512x128xf32, #tpu.memory_space<vmem>>, vector<512x128xf32>,
    } else {
    }
    %c1_i32 = arith.constant 1 : i32
    %11 = arith.cmpi eq, %arg0, %c1_i32 : i32
    %c0_i32_7 = arith.constant 0 : i32
    %12 = arith.cmpi eq, %arg1, %c0_i32_7 : i32
    %13 = arith.andi %11, %12 : i1
    %14 = arith.extui %13 : i1 to i32
    %c0_i32_8 = arith.constant 0 : i32
    %15 = arith.cmpi ne, %14, %c0_i32_8 : i32
    scf.if %15 {
      %c0_11 = arith.constant 0 : index
      %c0_12 = arith.constant 0 : index
      %19 = vector.load %arg5[%c0_11, %c0_12] : memref<1x128xf32, #tpu.memory_space<vmem>>, vector<1x128xf32>
      %cst_13 = arith.constant 0.001953125 : f32
      %20 = vector.broadcast %cst_13 : f32 to vector<1x128xf32>
      %21 = arith.mulf %19, %20 : vector<1x128xf32>
      %c0_14 = arith.constant 0 : index
      %c0_15 = arith.constant 0 : index
      %22 = vector.load %arg6[%c0_14, %c0_15] : memref<1x128xf32, #tpu.memory_space<vmem>>, vector<1x128xf32>
      %cst_16 = arith.constant 0.001953125 : f32
      %23 = vector.broadcast %cst_16 : f32 to vector<1x128xf32>
      %24 = arith.mulf %22, %23 : vector<1x128xf32>
      %25 = arith.mulf %21, %21 : vector<1x128xf32>
      %26 = arith.subf %24, %25 : vector<1x128xf32>
      %c0_17 = arith.constant 0 : index
      %c0_18 = arith.constant 0 : index
      %27 = vector.load %arg7[%c0_17, %c0_18] : memref<2x128xf32, #tpu.memory_space<vmem>>, vector<1x128xf32>
      tpu.vector_store %arg7[%c0_17, %c0_18], %21 {strides = array<i32>} : memref<2x128xf32, #tpu.memory_space<vmem>>, vector<1x128xf32>,
      %cst_19 = arith.constant 9.99999974E-6 : f32
      %28 = vector.broadcast %cst_19 : f32 to vector<1x128xf32>
      %29 = arith.addf %26, %28 : vector<1x128xf32>
      %30 = math.rsqrt %29 : vector<1x128xf32>
      %c1 = arith.constant 1 : index
      %c0_20 = arith.constant 0 : index
      %31 = vector.load %arg7[%c1, %c0_20] : memref<2x128xf32, #tpu.memory_space<vmem>>, vector<1x128xf32>
      tpu.vector_store %arg7[%c1, %c0_20], %30 {strides = array<i32>} : memref<2x128xf32, #tpu.memory_space<vmem>>, vector<1x128xf32>,
    } else {
    }
    %c1_i32_9 = arith.constant 1 : i32
    %16 = arith.cmpi eq, %arg0, %c1_i32_9 : i32
    %17 = arith.extui %16 : i1 to i32
    %c0_i32_10 = arith.constant 0 : i32
    %18 = arith.cmpi ne, %17, %c0_i32_10 : i32
    scf.if %18 {
      %c0_11 = arith.constant 0 : index
      %c0_12 = arith.constant 0 : index
      %19 = vector.load %arg7[%c0_11, %c0_12] : memref<2x128xf32, #tpu.memory_space<vmem>>, vector<1x128xf32>
      %20 = vector.broadcast %19 : vector<1x128xf32> to vector<512x128xf32>
      %21 = arith.subf %7, %20 : vector<512x128xf32>
      %c1 = arith.constant 1 : index
      %c0_13 = arith.constant 0 : index
      %22 = vector.load %arg7[%c1, %c0_13] : memref<2x128xf32, #tpu.memory_space<vmem>>, vector<1x128xf32>
      %23 = vector.broadcast %22 : vector<1x128xf32> to vector<512x128xf32>
      %24 = arith.mulf %21, %23 : vector<512x128xf32>
      %cst_14 = arith.constant 0.000000e+00 : f32
      %25 = vector.broadcast %cst_14 : f32 to vector<512x128xf32>
      %26 = arith.cmpf oge, %24, %25 : vector<512x128xf32>
      %cst_15 = arith.constant 0.00999999977 : f32
      %27 = vector.broadcast %cst_15 : f32 to vector<512x128xf32>
      %28 = arith.mulf %27, %24 : vector<512x128xf32>
      %29 = arith.select %26, %24, %28 : vector<512x128xi1>, vector<512x128xf32>
      %c0_16 = arith.constant 0 : index
      %c0_17 = arith.constant 0 : index
      %30 = vector.load %arg4[%c0_16, %c0_17] : memref<512x128xf32, #tpu.memory_space<vmem>>, vector<512x128xf32>
      tpu.vector_store %arg4[%c0_16, %c0_17], %29 {strides = array<i32>} : memref<512x128xf32, #tpu.memory_space<vmem>>, vector<512x128xf32>,
    } else {
    }
    return
  }
  func.func @transform_0(%arg0: i32, %arg1: i32) -> (i32, i32) {
    %c0_i32 = arith.constant 0 : i32
    %c0_i32_0 = arith.constant 0 : i32
    return %arg1, %c0_i32 : i32, i32
  }
  func.func @transform_1(%arg0: i32, %arg1: i32) -> (i32, i32) {
    %c0_i32 = arith.constant 0 : i32
    %c0_i32_0 = arith.constant 0 : i32
    %c0_i32_1 = arith.constant 0 : i32
    return %c0_i32, %c0_i32_0 : i32, i32
  }
  func.func @transform_2(%arg0: i32, %arg1: i32) -> (i32, i32) {
    %c0_i32 = arith.constant 0 : i32
    %c0_i32_0 = arith.constant 0 : i32
    return %arg1, %c0_i32 : i32, i32
  }
}

module attributes {stable_mosaic.version = 11 : i64} {
  func.func @_conv_bn_lrelu_kernel(%arg0: i32, %arg1: i32, %arg2: memref<128x128xbf16, #tpu.memory_space<vmem>>, %arg3: memref<128x128xbf16, #tpu.memory_space<vmem>>, %arg4: memref<128x128xf32, #tpu.memory_space<vmem>>, %arg5: memref<1x128xf32, #tpu.memory_space<vmem>>, %arg6: memref<1x128xf32, #tpu.memory_space<vmem>>, %arg7: memref<2x128xf32, #tpu.memory_space<vmem>>) attributes {dimension_semantics = [#tpu.dimension_semantics<arbitrary>, #tpu.dimension_semantics<arbitrary>], iteration_bounds = array<i64: 2, 1>, scalar_prefetch = 0 : i64, scratch_operands = 3 : i64, tpu.core_type = #tpu.core_type<tc>, window_params = [{transform_indices = @transform_0, window_bounds = array<i64: 128, 128>}, {pipeline_mode = #tpu.pipeline_mode<synchronous>, transform_indices = @transform_1, window_bounds = array<i64: 128, 128>}, {transform_indices = @transform_2, window_bounds = array<i64: 128, 128>}]} {
    %c0_i32 = arith.constant 0 : i32
    %0 = arith.cmpi eq, %arg0, %c0_i32 : i32
    %c0_i32_0 = arith.constant 0 : i32
    %1 = arith.cmpi eq, %arg1, %c0_i32_0 : i32
    %2 = arith.andi %0, %1 : i1
    %3 = arith.extui %2 : i1 to i32
    %c0_i32_1 = arith.constant 0 : i32
    %4 = arith.cmpi ne, %3, %c0_i32_1 : i32
    scf.if %4 {
      %cst_11 = arith.constant 0.000000e+00 : f32
      %19 = vector.broadcast %cst_11 : f32 to vector<1x128xf32>
      %c0_12 = arith.constant 0 : index
      %c0_13 = arith.constant 0 : index
      %20 = vector.load %arg5[%c0_12, %c0_13] : memref<1x128xf32, #tpu.memory_space<vmem>>, vector<1x128xf32>
      tpu.vector_store %arg5[%c0_12, %c0_13], %19 {strides = array<i32>} : memref<1x128xf32, #tpu.memory_space<vmem>>, vector<1x128xf32>,
      %cst_14 = arith.constant 0.000000e+00 : f32
      %21 = vector.broadcast %cst_14 : f32 to vector<1x128xf32>
      %c0_15 = arith.constant 0 : index
      %c0_16 = arith.constant 0 : index
      %22 = vector.load %arg6[%c0_15, %c0_16] : memref<1x128xf32, #tpu.memory_space<vmem>>, vector<1x128xf32>
      tpu.vector_store %arg6[%c0_15, %c0_16], %21 {strides = array<i32>} : memref<1x128xf32, #tpu.memory_space<vmem>>, vector<1x128xf32>,
    } else {
    }
    %c0 = arith.constant 0 : index
    %c0_2 = arith.constant 0 : index
    %5 = vector.load %arg2[%c0, %c0_2] : memref<128x128xbf16, #tpu.memory_space<vmem>>, vector<128x128xbf16>
    %c0_3 = arith.constant 0 : index
    %c0_4 = arith.constant 0 : index
    %6 = vector.load %arg3[%c0_3, %c0_4] : memref<128x128xbf16, #tpu.memory_space<vmem>>, vector<128x128xbf16>
    %cst = arith.constant dense<0.000000e+00> : vector<128x128xf32>
    %7 = tpu.matmul %5, %6, %cst {dimension_numbers = #tpu.dot_dimension_numbers<[1], [0], [0], [1], [0, 0, 1, 1], [], []>} : vector<128x128xbf16>, vector<128x128xbf16>, vector<128x128xf32> -> vector<128x128xf32>
    %c0_i32_5 = arith.constant 0 : i32
    %8 = arith.cmpi eq, %arg0, %c0_i32_5 : i32
    %9 = arith.extui %8 : i1 to i32
    %c0_i32_6 = arith.constant 0 : i32
    %10 = arith.cmpi ne, %9, %c0_i32_6 : i32
    scf.if %10 {
      %c0_11 = arith.constant 0 : index
      %c0_12 = arith.constant 0 : index
      %19 = vector.load %arg5[%c0_11, %c0_12] : memref<1x128xf32, #tpu.memory_space<vmem>>, vector<1x128xf32>
      %cst_13 = arith.constant dense<0.000000e+00> : vector<128xf32>
      %20 = vector.multi_reduction <add>, %7, %cst_13 [0] : vector<128x128xf32> to vector<128xf32>
      %21 = vector.shape_cast %20 : vector<128xf32> to vector<1x128xf32>
      %22 = arith.addf %19, %21 : vector<1x128xf32>
      %c0_14 = arith.constant 0 : index
      %c0_15 = arith.constant 0 : index
      %23 = vector.load %arg5[%c0_14, %c0_15] : memref<1x128xf32, #tpu.memory_space<vmem>>, vector<1x128xf32>
      tpu.vector_store %arg5[%c0_14, %c0_15], %22 {strides = array<i32>} : memref<1x128xf32, #tpu.memory_space<vmem>>, vector<1x128xf32>,
      %c0_16 = arith.constant 0 : index
      %c0_17 = arith.constant 0 : index
      %24 = vector.load %arg6[%c0_16, %c0_17] : memref<1x128xf32, #tpu.memory_space<vmem>>, vector<1x128xf32>
      %25 = arith.mulf %7, %7 : vector<128x128xf32>
      %cst_18 = arith.constant dense<0.000000e+00> : vector<128xf32>
      %26 = vector.multi_reduction <add>, %25, %cst_18 [0] : vector<128x128xf32> to vector<128xf32>
      %27 = vector.shape_cast %26 : vector<128xf32> to vector<1x128xf32>
      %28 = arith.addf %24, %27 : vector<1x128xf32>
      %c0_19 = arith.constant 0 : index
      %c0_20 = arith.constant 0 : index
      %29 = vector.load %arg6[%c0_19, %c0_20] : memref<1x128xf32, #tpu.memory_space<vmem>>, vector<1x128xf32>
      tpu.vector_store %arg6[%c0_19, %c0_20], %28 {strides = array<i32>} : memref<1x128xf32, #tpu.memory_space<vmem>>, vector<1x128xf32>,
      %c0_21 = arith.constant 0 : index
      %c0_22 = arith.constant 0 : index
      %30 = vector.load %arg4[%c0_21, %c0_22] : memref<128x128xf32, #tpu.memory_space<vmem>>, vector<128x128xf32>
      tpu.vector_store %arg4[%c0_21, %c0_22], %7 {strides = array<i32>} : memref<128x128xf32, #tpu.memory_space<vmem>>, vector<128x128xf32>,
    } else {
    }
    %c1_i32 = arith.constant 1 : i32
    %11 = arith.cmpi eq, %arg0, %c1_i32 : i32
    %c0_i32_7 = arith.constant 0 : i32
    %12 = arith.cmpi eq, %arg1, %c0_i32_7 : i32
    %13 = arith.andi %11, %12 : i1
    %14 = arith.extui %13 : i1 to i32
    %c0_i32_8 = arith.constant 0 : i32
    %15 = arith.cmpi ne, %14, %c0_i32_8 : i32
    scf.if %15 {
      %c0_11 = arith.constant 0 : index
      %c0_12 = arith.constant 0 : index
      %19 = vector.load %arg5[%c0_11, %c0_12] : memref<1x128xf32, #tpu.memory_space<vmem>>, vector<1x128xf32>
      %cst_13 = arith.constant 7.812500e-03 : f32
      %20 = vector.broadcast %cst_13 : f32 to vector<1x128xf32>
      %21 = arith.mulf %19, %20 : vector<1x128xf32>
      %c0_14 = arith.constant 0 : index
      %c0_15 = arith.constant 0 : index
      %22 = vector.load %arg6[%c0_14, %c0_15] : memref<1x128xf32, #tpu.memory_space<vmem>>, vector<1x128xf32>
      %cst_16 = arith.constant 7.812500e-03 : f32
      %23 = vector.broadcast %cst_16 : f32 to vector<1x128xf32>
      %24 = arith.mulf %22, %23 : vector<1x128xf32>
      %25 = arith.mulf %21, %21 : vector<1x128xf32>
      %26 = arith.subf %24, %25 : vector<1x128xf32>
      %c0_17 = arith.constant 0 : index
      %c0_18 = arith.constant 0 : index
      %27 = vector.load %arg7[%c0_17, %c0_18] : memref<2x128xf32, #tpu.memory_space<vmem>>, vector<1x128xf32>
      tpu.vector_store %arg7[%c0_17, %c0_18], %21 {strides = array<i32>} : memref<2x128xf32, #tpu.memory_space<vmem>>, vector<1x128xf32>,
      %cst_19 = arith.constant 9.99999974E-6 : f32
      %28 = vector.broadcast %cst_19 : f32 to vector<1x128xf32>
      %29 = arith.addf %26, %28 : vector<1x128xf32>
      %30 = math.rsqrt %29 : vector<1x128xf32>
      %c1 = arith.constant 1 : index
      %c0_20 = arith.constant 0 : index
      %31 = vector.load %arg7[%c1, %c0_20] : memref<2x128xf32, #tpu.memory_space<vmem>>, vector<1x128xf32>
      tpu.vector_store %arg7[%c1, %c0_20], %30 {strides = array<i32>} : memref<2x128xf32, #tpu.memory_space<vmem>>, vector<1x128xf32>,
    } else {
    }
    %c1_i32_9 = arith.constant 1 : i32
    %16 = arith.cmpi eq, %arg0, %c1_i32_9 : i32
    %17 = arith.extui %16 : i1 to i32
    %c0_i32_10 = arith.constant 0 : i32
    %18 = arith.cmpi ne, %17, %c0_i32_10 : i32
    scf.if %18 {
      %c0_11 = arith.constant 0 : index
      %c0_12 = arith.constant 0 : index
      %19 = vector.load %arg7[%c0_11, %c0_12] : memref<2x128xf32, #tpu.memory_space<vmem>>, vector<1x128xf32>
      %20 = vector.broadcast %19 : vector<1x128xf32> to vector<128x128xf32>
      %21 = arith.subf %7, %20 : vector<128x128xf32>
      %c1 = arith.constant 1 : index
      %c0_13 = arith.constant 0 : index
      %22 = vector.load %arg7[%c1, %c0_13] : memref<2x128xf32, #tpu.memory_space<vmem>>, vector<1x128xf32>
      %23 = vector.broadcast %22 : vector<1x128xf32> to vector<128x128xf32>
      %24 = arith.mulf %21, %23 : vector<128x128xf32>
      %cst_14 = arith.constant 0.000000e+00 : f32
      %25 = vector.broadcast %cst_14 : f32 to vector<128x128xf32>
      %26 = arith.cmpf oge, %24, %25 : vector<128x128xf32>
      %cst_15 = arith.constant 0.00999999977 : f32
      %27 = vector.broadcast %cst_15 : f32 to vector<128x128xf32>
      %28 = arith.mulf %27, %24 : vector<128x128xf32>
      %29 = arith.select %26, %24, %28 : vector<128x128xi1>, vector<128x128xf32>
      %c0_16 = arith.constant 0 : index
      %c0_17 = arith.constant 0 : index
      %30 = vector.load %arg4[%c0_16, %c0_17] : memref<128x128xf32, #tpu.memory_space<vmem>>, vector<128x128xf32>
      tpu.vector_store %arg4[%c0_16, %c0_17], %29 {strides = array<i32>} : memref<128x128xf32, #tpu.memory_space<vmem>>, vector<128x128xf32>,
    } else {
    }
    return
  }
  func.func @transform_0(%arg0: i32, %arg1: i32) -> (i32, i32) {
    %c0_i32 = arith.constant 0 : i32
    %c0_i32_0 = arith.constant 0 : i32
    return %arg1, %c0_i32 : i32, i32
  }
  func.func @transform_1(%arg0: i32, %arg1: i32) -> (i32, i32) {
    %c0_i32 = arith.constant 0 : i32
    %c0_i32_0 = arith.constant 0 : i32
    %c0_i32_1 = arith.constant 0 : i32
    return %c0_i32, %c0_i32_0 : i32, i32
  }
  func.func @transform_2(%arg0: i32, %arg1: i32) -> (i32, i32) {
    %c0_i32 = arith.constant 0 : i32
    %c0_i32_0 = arith.constant 0 : i32
    return %arg1, %c0_i32 : i32, i32
  }
}

</mosaic_0001>

<bundles_post_ra>
// kernel: discrim_block_forward.2
= control target key start
LH: loop header
LB: loop body
LE: loop exit
PB: predicated region body
PF: predicated region fallthrough
CT: control target
= control target key end

     0   :  { %s1718_s9 = smov 0   ;;  %s1720_s10 = smov 0   ;;  %s2835_s0 = inlined_call_operand.vmem [shape: bf16[512,128], index: 0, kind: input, shape index: {}]   ;;  %s2836_s1 = inlined_call_operand.vmem [shape: bf16[128,128], index: 1, kind: input, shape index: {}]   ;;  %s2837_s2 = inlined_call_operand.vmem [shape: f32[512,128], index: 2, kind: output, shape index: {}]  }
   0x1   :  { %s1722_s11 = smov 0  }
   0x2 LB: > { %s24_s12 = sadd.s32 1, %s1696_s10  ;;  %p1414_p0 = scmp.ge.s32.totalorder %s1700_s11, 1  ;;  %s1700_s11 = sphi %s1722_s11, %s12_s11   ;;  %s1696_s10 = sphi %s1720_s10, %s2917_s10   ;;  %s1692_s9 = sphi %s1718_s9, %s2916_s9  }
   0x3   : > { %p26_p1 = scmp.ge.s32.totalorder %s24_s12, 2  ;;  %p125_p2 = scmp.lt.s32.totalorder %s1700_s11, 3 }
   0x5   : > { %s2919_s12 = smov (%p26_p1, %s24_s12), 0  ;;  %p126_p3 = pnand %p1414_p0, %p125_p2 }
   0x7   : > { %129 = sbr.rel (%p126_p3) target bundleno = 572 (0x23c), region = 28 }
   0xc   : > { %p159_p4 = scmp.eq.s32.totalorder %s1692_s9, 0 }
   0xd   : > { %v1702_v0 = vmov (%p159_p4), 0.0  }
   0xe   : > { %164 = sbr.rel (!%p159_p4) target bundleno = 19 (0x13), region = 32  ;;  %165 = vst [vmem:[#allocation2] sm:$0x1] (%p159_p4), %v1702_v0 }
   0xf   : > { %166 = vst [vmem:[#allocation3] sm:$0x1] (%p159_p4), %v1702_v0 }
  0x13 PF: > { %v1623_v1 = vld [vmem:[%s2836_s1 + $0x38] sm:$0xff]  ;;  %v1622_v2 = vld [vmem:[%s2836_s1 + $0x30] sm:$0xff]  ;;  %v1621_v3 = vld [vmem:[%s2836_s1 + $0x28] sm:$0xff]  ;;  %p1576_p5 = scmp.ne.s32.totalorder %s1692_s9, 0 }
  0x14   : > { %487 = vmatpush.bf16.msra.mxu0 %v1623_v1  ;;  %1625 = vmatpush.bf16.msra.mxu1 %v1623_v1  ;;  %v1620_v4 = vld [vmem:[%s2836_s1 + $0x20] sm:$0xff]  ;;  %v1619_v5 = vld [vmem:[%s2836_s1 + $0x18] sm:$0xff]  ;;  %v1618_v6 = vld [vmem:[%s2836_s1 + $0x10] sm:$0xff] }
  0x15   : > { %1626 = vmatpush.bf16.msra.mxu2 %v1623_v1  ;;  %1627 = vmatpush.bf16.msra.mxu3 %v1623_v1  ;;  %v1617_v7 = vld [vmem:[%s2836_s1 + $0x8] sm:$0xff]  ;;  %v1616_v8 = vld [vmem:[%s2836_s1] sm:$0xff]  ;;  %v1586_v17 = vld [vmem:[%s2835_s0 + $0x10] sm:$0xff] }
  0x16   : > { %v1584_v9 = vld [vmem:[%s2835_s0] sm:$0xff]  ;;  %v1585_v13 = vld [vmem:[%s2835_s0 + $0x8] sm:$0xff]  ;;  %v1594_v18 = vld [vmem:[%s2835_s0 + $0x50] sm:$0xff] }
  0x17   : > { %v1592_v10 = vld [vmem:[%s2835_s0 + $0x40] sm:$0xff]  ;;  %v1593_v14 = vld [vmem:[%s2835_s0 + $0x48] sm:$0xff]  ;;  %v1602_v19 = vld [vmem:[%s2835_s0 + $0x90] sm:$0xff] }
  0x18   : > { %488 = vmatpush.bf16.msra.mxu0 %v1622_v2  ;;  %1628 = vmatpush.bf16.msra.mxu1 %v1622_v2  ;;  %v1600_v11 = vld [vmem:[%s2835_s0 + $0x80] sm:$0xff]  ;;  %v1601_v15 = vld [vmem:[%s2835_s0 + $0x88] sm:$0xff]  ;;  %v1610_v20 = vld [vmem:[%s2835_s0 + $0xd0] sm:$0xff] }
  0x19   : > { %1629 = vmatpush.bf16.msra.mxu2 %v1622_v2  ;;  %1630 = vmatpush.bf16.msra.mxu3 %v1622_v2  ;;  %v1608_v12 = vld [vmem:[%s2835_s0 + $0xc0] sm:$0xff]  ;;  %v1609_v16 = vld [vmem:[%s2835_s0 + $0xc8] sm:$0xff]  ;;  %v1587_v21 = vld [vmem:[%s2835_s0 + $0x18] sm:$0xff] }
  0x1a   : > { %v1595_v22 = vld [vmem:[%s2835_s0 + $0x58] sm:$0xff]  ;;  %v1588_v25 = vld [vmem:[%s2835_s0 + $0x20] sm:$0xff]  ;;  %v1589_v29 = vld [vmem:[%s2835_s0 + $0x28] sm:$0xff] }
  0x1b   : > { %v1603_v23 = vld [vmem:[%s2835_s0 + $0x98] sm:$0xff]  ;;  %v1596_v26 = vld [vmem:[%s2835_s0 + $0x60] sm:$0xff]  ;;  %v1597_v30 = vld [vmem:[%s2835_s0 + $0x68] sm:$0xff] }
  0x1c   : > { %489 = vmatpush.bf16.msra.mxu0 %v1621_v3  ;;  %1631 = vmatpush.bf16.msra.mxu1 %v1621_v3  ;;  %v1611_v24 = vld [vmem:[%s2835_s0 + $0xd8] sm:$0xff]  ;;  %v1604_v27 = vld [vmem:[%s2835_s0 + $0xa0] sm:$0xff]  ;;  %v1605_v31 = vld [vmem:[%s2835_s0 + $0xa8] sm:$0xff] }
  0x1d   : > { %1632 = vmatpush.bf16.msra.mxu2 %v1621_v3  ;;  %1633 = vmatpush.bf16.msra.mxu3 %v1621_v3  ;;  %v1612_v28 = vld [vmem:[%s2835_s0 + $0xe0] sm:$0xff]  ;;  %v1613_v32 = vld [vmem:[%s2835_s0 + $0xe8] sm:$0xff]  ;;  %v1590_v33 = vld [vmem:[%s2835_s0 + $0x30] sm:$0xff] }
  0x1e   : > { %v1598_v34 = vld [vmem:[%s2835_s0 + $0x70] sm:$0xff]  ;;  %v1591_v37 = vld [vmem:[%s2835_s0 + $0x38] sm:$0xff] }
  0x1f   : > { %v1606_v35 = vld [vmem:[%s2835_s0 + $0xb0] sm:$0xff]  ;;  %v1599_v38 = vld [vmem:[%s2835_s0 + $0x78] sm:$0xff] }
  0x20   : > { %490 = vmatpush.bf16.msra.mxu0 %v1620_v4  ;;  %1634 = vmatpush.bf16.msra.mxu1 %v1620_v4  ;;  %v1614_v36 = vld [vmem:[%s2835_s0 + $0xf0] sm:$0xff]  ;;  %v1607_v39 = vld [vmem:[%s2835_s0 + $0xb8] sm:$0xff] }
  0x21   : > { %1635 = vmatpush.bf16.msra.mxu2 %v1620_v4  ;;  %1636 = vmatpush.bf16.msra.mxu3 %v1620_v4  ;;  %v1615_v40 = vld [vmem:[%s2835_s0 + $0xf8] sm:$0xff] }
  0x24   : > { %491 = vmatpush.bf16.msra.mxu0 %v1619_v5  ;;  %1637 = vmatpush.bf16.msra.mxu1 %v1619_v5 }
  0x25   : > { %1638 = vmatpush.bf16.msra.mxu2 %v1619_v5  ;;  %1639 = vmatpush.bf16.msra.mxu3 %v1619_v5 }
  0x28   : > { %492 = vmatpush.bf16.msra.mxu0 %v1618_v6  ;;  %1640 = vmatpush.bf16.msra.mxu1 %v1618_v6 }
  0x29   : > { %1641 = vmatpush.bf16.msra.mxu2 %v1618_v6  ;;  %1642 = vmatpush.bf16.msra.mxu3 %v1618_v6 }
  0x2c   : > { %493 = vmatpush.bf16.msra.mxu0 %v1617_v7  ;;  %1643 = vmatpush.bf16.msra.mxu1 %v1617_v7 }
  0x2d   : > { %1644 = vmatpush.bf16.msra.mxu2 %v1617_v7  ;;  %1645 = vmatpush.bf16.msra.mxu3 %v1617_v7 }
  0x30   : > { %494 = vmatpush.bf16.msra.mxu0 %v1616_v8  ;;  %1646 = vmatpush.bf16.msra.mxu1 %v1616_v8 }
  0x31   : > { %1647 = vmatpush.bf16.msra.mxu2 %v1616_v8  ;;  %1648 = vmatpush.bf16.msra.mxu3 %v1616_v8 }
  0x33   : > { %495 = vmatmul.bf16.vlgmr.msra.gmra.mxu0 %v1584_v9  ;;  %535 = vmatmul.bf16.vlgmr.msra.gmra.mxu1 %v1592_v10 }
  0x34   : > { %575 = vmatmul.bf16.vlgmr.msra.gmra.mxu2 %v1600_v11  ;;  %615 = vmatmul.bf16.vlgmr.msra.gmra.mxu3 %v1608_v12 }
  0x43   : > { %500 = vmatmul.bf16.gmra.mxu0 %v1585_v13  ;;  %540 = vmatmul.bf16.gmra.mxu1 %v1593_v14 }
  0x44   : > { %580 = vmatmul.bf16.gmra.mxu2 %v1601_v15  ;;  %620 = vmatmul.bf16.gmra.mxu3 %v1609_v16 }
  0x53   : > { %505 = vmatmul.bf16.gmra.mxu0 %v1586_v17  ;;  %545 = vmatmul.bf16.gmra.mxu1 %v1594_v18 }
  0x54   : > { %585 = vmatmul.bf16.gmra.mxu2 %v1602_v19  ;;  %625 = vmatmul.bf16.gmra.mxu3 %v1610_v20 }
  0x63   : > { %510 = vmatmul.bf16.gmra.mxu0 %v1587_v21  ;;  %550 = vmatmul.bf16.gmra.mxu1 %v1595_v22 }
  0x64   : > { %590 = vmatmul.bf16.gmra.mxu2 %v1603_v23  ;;  %630 = vmatmul.bf16.gmra.mxu3 %v1611_v24 }
  0x73   : > { %515 = vmatmul.bf16.gmra.mxu0 %v1588_v25  ;;  %555 = vmatmul.bf16.gmra.mxu1 %v1596_v26 }
  0x74   : > { %595 = vmatmul.bf16.gmra.mxu2 %v1604_v27  ;;  %635 = vmatmul.bf16.gmra.mxu3 %v1612_v28 }
  0x83   : > { %520 = vmatmul.bf16.gmra.mxu0 %v1589_v29  ;;  %560 = vmatmul.bf16.gmra.mxu1 %v1597_v30 }
  0x84   : > { %600 = vmatmul.bf16.gmra.mxu2 %v1605_v31  ;;  %640 = vmatmul.bf16.gmra.mxu3 %v1613_v32 }
  0x93   : > { %525 = vmatmul.bf16.gmra.mxu0 %v1590_v33  ;;  %565 = vmatmul.bf16.gmra.mxu1 %v1598_v34 }
  0x94   : > { %605 = vmatmul.bf16.gmra.mxu2 %v1606_v35  ;;  %645 = vmatmul.bf16.gmra.mxu3 %v1614_v36 }
  0xa3   : > { %530 = vmatmul.bf16.gmra.mxu0 %v1591_v37  ;;  %570 = vmatmul.bf16.gmra.mxu1 %v1599_v38 }
  0xa4   : > { %610 = vmatmul.bf16.gmra.mxu2 %v1607_v39  ;;  %650 = vmatmul.bf16.gmra.mxu3 %v1615_v40 }
  0xb0   : > { %v1859_v41 = vpop.f32.mrf.mxu0  ;;  %v1861_v42 = vpop.f32.mrf.mxu1 }
  0xb1   : > { %2862 = vst [vmem:[#allocation5_spill] sm:$0xff] %v1859_v41 }
  0xb7   : > { %v1863_v43 = vpop.f32.mrf.mxu2  ;;  %v1865_v44 = vpop.f32.mrf.mxu3 }
  0xb8   : > { %2863 = vst [vmem:[#allocation6_spill] sm:$0xff] %v1863_v43  ;;  %v1867_v45 = vpop.f32.mrf.mxu0  ;;  %v1869_v46 = vpop.f32.mrf.mxu1 }
  0xb9   : > { %2864 = vst [vmem:[#allocation7_spill] sm:$0xff] %v1867_v45 }
  0xbf   : > { %v1871_v47 = vpop.f32.mrf.mxu2  ;;  %v1873_v48 = vpop.f32.mrf.mxu3 }
  0xc0   : > { %v1875_v49 = vpop.f32.mrf.mxu0  ;;  %v1877_v50 = vpop.f32.mrf.mxu1 }
  0xc1   : > { %2865 = vst [vmem:[#allocation8_spill] sm:$0xff] %v1875_v49 }
  0xc7   : > { %v1879_v51 = vpop.f32.mrf.mxu2  ;;  %v1881_v52 = vpop.f32.mrf.mxu3 }
  0xc8   : > { %v1883_v53 = vpop.f32.mrf.mxu0  ;;  %v1885_v54 = vpop.f32.mrf.mxu1 }
  0xcf   : > { %v1887_v55 = vpop.f32.mrf.mxu2  ;;  %v1889_v56 = vpop.f32.mrf.mxu3 }
  0xd0   : > { %v1891_v57 = vpop.f32.mrf.mxu0  ;;  %v1893_v58 = vpop.f32.mrf.mxu1 }
  0xd7   : > { %v1895_v59 = vpop.f32.mrf.mxu2  ;;  %v1897_v60 = vpop.f32.mrf.mxu3 }
  0xd8   : > { %v1899_v61 = vpop.f32.mrf.mxu0  ;;  %v1901_v62 = vpop.f32.mrf.mxu1 }
  0xd9   : > { %2866 = vst [vmem:[#allocation9_spill] sm:$0xff] %v1901_v62 }
  0xdf   : > { %v1903_v63 = vpop.f32.mrf.mxu2  ;;  %v1905_v0 = vpop.f32.mrf.mxu3 }
  0xe0   : > { %v1907_v1 = vpop.f32.mrf.mxu0  ;;  %v1909_v2 = vpop.f32.mrf.mxu1 }
  0xe1   : > { %2867 = vst [vmem:[#allocation10_spill] sm:$0xff] %v1909_v2 }
  0xe7   : > { %v1911_v3 = vpop.f32.mrf.mxu2  ;;  %v1913_v4 = vpop.f32.mrf.mxu3 }
  0xe8   : > { %v1915_v5 = vpop.f32.mrf.mxu0  ;;  %v1917_v6 = vpop.f32.mrf.mxu1 }
  0xe9   : > { %2868 = vst [vmem:[#allocation11_spill] sm:$0xff] %v1917_v6 }
  0xef   : > { %v1919_v7 = vpop.f32.mrf.mxu2  ;;  %v1921_v8 = vpop.f32.mrf.mxu3 }
  0xf0   : > { %2869 = vst [vmem:[#allocation12_spill] sm:$0xff] %v1921_v8  ;;  %v1923_v9 = vpop.f32.mrf.mxu0  ;;  %v1925_v10 = vpop.f32.mrf.mxu1 }
  0xf1   : > { %2870 = vst [vmem:[#allocation13_spill] sm:$0xff] %v1925_v10 }
  0xf7   : > { %v1927_v11 = vpop.f32.mrf.mxu2  ;;  %v1929_v12 = vpop.f32.mrf.mxu3 }
  0xf8   : > { %2871 = vst [vmem:[#allocation14_spill] sm:$0xff] %v1929_v12  ;;  %v1931_v13 = vpop.f32.mrf.mxu0  ;;  %v1933_v14 = vpop.f32.mrf.mxu1 }
  0xf9   : > { %2872 = vst [vmem:[#allocation15_spill] sm:$0xff] %v1933_v14 }
  0xff   : > { %v1935_v15 = vpop.f32.mrf.mxu2  ;;  %v1937_v16 = vpop.f32.mrf.mxu3 }
 0x100   : > { %2873 = vst [vmem:[#allocation16_spill] sm:$0xff] %v1937_v16  ;;  %v1939_v17 = vpop.f32.mrf.mxu0  ;;  %v1941_v18 = vpop.f32.mrf.mxu1 }
 0x101   : > { %2874 = vst [vmem:[#allocation17_spill] sm:$0xff] %v1941_v18 }
 0x107   : > { %v1943_v19 = vpop.f32.mrf.mxu2  ;;  %v1945_v20 = vpop.f32.mrf.mxu3 }
 0x108   : > { %2875 = vst [vmem:[#allocation18_spill] sm:$0xff] %v1945_v20  ;;  %v1947_v21 = vpop.f32.mrf.mxu0  ;;  %v1949_v22 = vpop.f32.mrf.mxu1 }
 0x109   : > { %2876 = vst [vmem:[#allocation19_spill] sm:$0xff] %v1949_v22 }
 0x10f   : > { %v1951_v23 = vpop.f32.mrf.mxu2  ;;  %v1953_v24 = vpop.f32.mrf.mxu3 }
 0x110   : > { %2877 = vst [vmem:[#allocation20_spill] sm:$0xff] %v1953_v24  ;;  %v1955_v25 = vpop.f32.mrf.mxu0  ;;  %v1957_v26 = vpop.f32.mrf.mxu1 }
 0x111   : > { %2878 = vst [vmem:[#allocation21_spill] sm:$0xff] %v1957_v26 }
 0x117   : > { %v1959_v27 = vpop.f32.mrf.mxu2  ;;  %v1961_v28 = vpop.f32.mrf.mxu3 }
 0x118   : > { %2879 = vst [vmem:[#allocation22_spill] sm:$0xff] %v1961_v28  ;;  %v1963_v29 = vpop.f32.mrf.mxu0  ;;  %v1965_v30 = vpop.f32.mrf.mxu1 }
 0x119   : > { %2880 = vst [vmem:[#allocation23_spill] sm:$0xff] %v1965_v30 }
 0x11f   : > { %v1967_v31 = vpop.f32.mrf.mxu2  ;;  %v1969_v32 = vpop.f32.mrf.mxu3 }
 0x120   : > { %2881 = vst [vmem:[#allocation24_spill] sm:$0xff] %v1969_v32  ;;  %v1971_v33 = vpop.f32.mrf.mxu0  ;;  %v1973_v34 = vpop.f32.mrf.mxu1 }
 0x121   : > { %2882 = vst [vmem:[#allocation25_spill] sm:$0xff] %v1973_v34 }
 0x127   : > { %v1975_v35 = vpop.f32.mrf.mxu2  ;;  %v1977_v36 = vpop.f32.mrf.mxu3 }
 0x128   : > { %2883 = vst [vmem:[#allocation26_spill] sm:$0xff] %v1977_v36  ;;  %v1979_v37 = vpop.f32.mrf.mxu0  ;;  %v1981_v38 = vpop.f32.mrf.mxu1 }
 0x129   : > { %2884 = vst [vmem:[#allocation27_spill] sm:$0xff] %v1981_v38 }
 0x12c   : > { %658 = sbr.rel (%p1576_p5) target bundleno = 448 (0x1c0), region = 36 }
 0x12f   : > { %v1983_v39 = vpop.f32.mrf.mxu2  ;;  %v1985_v40 = vpop.f32.mrf.mxu3 }
 0x130   : > { %2885 = vst [vmem:[#allocation28_spill] sm:$0xff] %v1985_v40 }
 0x131   : > { %v660_v32 = vadd.f32 %v1867_v45, %v1859_v41  ;;  %867 = vst [vmem:[%s2837_s2] sm:$0xff] %v1859_v41  ;;  %v732_v36 = vmul.f32 %v1859_v41, %v1859_v41  ;;  %v733_v28 = vmul.f32 %v1867_v45, %v1867_v45  ;;  %v734_v24 = vmul.f32 %v1875_v49, %v1875_v49 }
 0x132   : > { %868 = vst [vmem:[%s2837_s2 + $0x8] sm:$0xff] %v1867_v45 }
 0x133   : > { %v661_v40 = vadd.f32 %v660_v32, %v1875_v49  ;;  %869 = vst [vmem:[%s2837_s2 + $0x10] sm:$0xff] %v1875_v49  ;;  %v735_v32 = vmul.f32 %v1883_v53, %v1883_v53  ;;  %v796_v45 = vadd.f32 %v733_v28, %v732_v36 }
 0x134   : > { %870 = vst [vmem:[%s2837_s2 + $0x18] sm:$0xff] %v1883_v53 }
 0x135   : > { %v662_v41 = vadd.f32 %v661_v40, %v1883_v53  ;;  %871 = vst [vmem:[%s2837_s2 + $0x20] sm:$0xff] %v1891_v57  ;;  %v736_v40 = vmul.f32 %v1891_v57, %v1891_v57  ;;  %v797_v20 = vadd.f32 %v796_v45, %v734_v24 }
 0x136   : > { %872 = vst [vmem:[%s2837_s2 + $0x28] sm:$0xff] %v1899_v61 }
 0x137   : > { %v663_v49 = vadd.f32 %v662_v41, %v1891_v57  ;;  %873 = vst [vmem:[%s2837_s2 + $0x30] sm:$0xff] %v1907_v1  ;;  %v737_v41 = vmul.f32 %v1899_v61, %v1899_v61  ;;  %v798_v36 = vadd.f32 %v797_v20, %v735_v32  ;;  %v739_v32 = vmul.f32 %v1915_v5, %v1915_v5 }
 0x138   : > { %874 = vst [vmem:[%s2837_s2 + $0x38] sm:$0xff] %v1915_v5 }
 0x139   : > { %v664_v28 = vadd.f32 %v663_v49, %v1899_v61  ;;  %875 = vst [vmem:[%s2837_s2 + $0x40] sm:$0xff] %v1923_v9  ;;  %v738_v49 = vmul.f32 %v1907_v1, %v1907_v1  ;;  %v799_v24 = vadd.f32 %v798_v36, %v736_v40  ;;  %v740_v36 = vmul.f32 %v1923_v9, %v1923_v9 }
 0x13a   : > { %876 = vst [vmem:[%s2837_s2 + $0x48] sm:$0xff] %v1931_v13 }
 0x13b   : > { %v665_v45 = vadd.f32 %v664_v28, %v1907_v1  ;;  %877 = vst [vmem:[%s2837_s2 + $0x50] sm:$0xff] %v1939_v17  ;;  %v800_v28 = vadd.f32 %v799_v24, %v737_v41  ;;  %v741_v24 = vmul.f32 %v1931_v13, %v1931_v13 }
 0x13c   : > { %878 = vst [vmem:[%s2837_s2 + $0x58] sm:$0xff] %v1947_v21 }
 0x13d   : > { %v666_v20 = vadd.f32 %v665_v45, %v1915_v5  ;;  %879 = vst [vmem:[%s2837_s2 + $0x60] sm:$0xff] %v1955_v25  ;;  %v801_v45 = vadd.f32 %v800_v28, %v738_v49  ;;  %v742_v28 = vmul.f32 %v1939_v17, %v1939_v17 }
 0x13e   : > { %880 = vst [vmem:[%s2837_s2 + $0x68] sm:$0xff] %v1963_v29 }
 0x13f   : > { %v667_v40 = vadd.f32 %v666_v20, %v1923_v9  ;;  %881 = vst [vmem:[%s2837_s2 + $0x70] sm:$0xff] %v1971_v33  ;;  %v802_v20 = vadd.f32 %v801_v45, %v739_v32  ;;  %v743_v45 = vmul.f32 %v1947_v21, %v1947_v21 }
 0x140   : > { %882 = vst [vmem:[%s2837_s2 + $0x78] sm:$0xff] %v1979_v37 }
 0x141   : > { %v668_v41 = vadd.f32 %v667_v40, %v1931_v13  ;;  %883 = vst [vmem:[%s2837_s2 + $0x80] sm:$0xff] %v1861_v42  ;;  %v803_v40 = vadd.f32 %v802_v20, %v740_v36  ;;  %v744_v20 = vmul.f32 %v1955_v25, %v1955_v25 }
 0x142   : > { %884 = vst [vmem:[%s2837_s2 + $0x88] sm:$0xff] %v1869_v46 }
 0x143   : > { %v669_v49 = vadd.f32 %v668_v41, %v1939_v17  ;;  %885 = vst [vmem:[%s2837_s2 + $0x90] sm:$0xff] %v1877_v50  ;;  %v804_v41 = vadd.f32 %v803_v40, %v741_v24  ;;  %v745_v40 = vmul.f32 %v1963_v29, %v1963_v29 }
 0x144   : > { %886 = vst [vmem:[%s2837_s2 + $0x98] sm:$0xff] %v1885_v54 }
 0x145   : > { %v670_v32 = vadd.f32 %v669_v49, %v1947_v21  ;;  %887 = vst [vmem:[%s2837_s2 + $0xa0] sm:$0xff] %v1893_v58  ;;  %v805_v49 = vadd.f32 %v804_v41, %v742_v28  ;;  %v746_v41 = vmul.f32 %v1971_v33, %v1971_v33 }
 0x146   : > { %888 = vst [vmem:[%s2837_s2 + $0xa8] sm:$0xff] %v1901_v62 }
 0x147   : > { %v671_v36 = vadd.f32 %v670_v32, %v1955_v25  ;;  %889 = vst [vmem:[%s2837_s2 + $0xb0] sm:$0xff] %v1909_v2  ;;  %v806_v32 = vadd.f32 %v805_v49, %v743_v45  ;;  %v747_v49 = vmul.f32 %v1979_v37, %v1979_v37 }
 0x148   : > { %890 = vst [vmem:[%s2837_s2 + $0xb8] sm:$0xff] %v1917_v6 }
 0x149   : > { %v672_v24 = vadd.f32 %v671_v36, %v1963_v29  ;;  %891 = vst [vmem:[%s2837_s2 + $0xc0] sm:$0xff] %v1925_v10  ;;  %v807_v36 = vadd.f32 %v806_v32, %v744_v20  ;;  %v748_v32 = vmul.f32 %v1861_v42, %v1861_v42 }
 0x14a   : > { %892 = vst [vmem:[%s2837_s2 + $0xc8] sm:$0xff] %v1933_v14 }
 0x14b   : > { %v673_v28 = vadd.f32 %v672_v24, %v1971_v33  ;;  %893 = vst [vmem:[%s2837_s2 + $0xd0] sm:$0xff] %v1941_v18  ;;  %v808_v24 = vadd.f32 %v807_v36, %v745_v40  ;;  %v749_v36 = vmul.f32 %v1869_v46, %v1869_v46 }
 0x14c   : > { %894 = vst [vmem:[%s2837_s2 + $0xd8] sm:$0xff] %v1949_v22 }
 0x14d   : > { %v674_v45 = vadd.f32 %v673_v28, %v1979_v37  ;;  %895 = vst [vmem:[%s2837_s2 + $0xe0] sm:$0xff] %v1957_v26  ;;  %v809_v28 = vadd.f32 %v808_v24, %v746_v41  ;;  %v750_v24 = vmul.f32 %v1877_v50, %v1877_v50 }
 0x14e   : > { %896 = vst [vmem:[%s2837_s2 + $0xe8] sm:$0xff] %v1965_v30 }
 0x14f   : > { %v675_v20 = vadd.f32 %v674_v45, %v1861_v42  ;;  %897 = vst [vmem:[%s2837_s2 + $0xf0] sm:$0xff] %v1973_v34  ;;  %v810_v45 = vadd.f32 %v809_v28, %v747_v49  ;;  %v751_v28 = vmul.f32 %v1885_v54, %v1885_v54 }
 0x150   : > { %898 = vst [vmem:[%s2837_s2 + $0xf8] sm:$0xff] %v1981_v38 }
 0x151   : > { %v676_v40 = vadd.f32 %v675_v20, %v1869_v46  ;;  %899 = vst [vmem:[%s2837_s2 + $0x100] sm:$0xff] %v1863_v43  ;;  %v811_v20 = vadd.f32 %v810_v45, %v748_v32  ;;  %v752_v45 = vmul.f32 %v1893_v58, %v1893_v58 }
 0x152   : > { %900 = vst [vmem:[%s2837_s2 + $0x108] sm:$0xff] %v1871_v47 }
 0x153   : > { %v677_v41 = vadd.f32 %v676_v40, %v1877_v50  ;;  %901 = vst [vmem:[%s2837_s2 + $0x110] sm:$0xff] %v1879_v51  ;;  %v812_v40 = vadd.f32 %v811_v20, %v749_v36  ;;  %v753_v20 = vmul.f32 %v1901_v62, %v1901_v62 }
 0x154   : > { %902 = vst [vmem:[%s2837_s2 + $0x118] sm:$0xff] %v1887_v55 }
 0x155   : > { %v678_v49 = vadd.f32 %v677_v41, %v1885_v54  ;;  %903 = vst [vmem:[%s2837_s2 + $0x120] sm:$0xff] %v1895_v59  ;;  %v813_v41 = vadd.f32 %v812_v40, %v750_v24  ;;  %v754_v40 = vmul.f32 %v1909_v2, %v1909_v2 }
 0x156   : > { %904 = vst [vmem:[%s2837_s2 + $0x128] sm:$0xff] %v1903_v63 }
 0x157   : > { %v679_v32 = vadd.f32 %v678_v49, %v1893_v58  ;;  %905 = vst [vmem:[%s2837_s2 + $0x130] sm:$0xff] %v1911_v3  ;;  %v814_v49 = vadd.f32 %v813_v41, %v751_v28  ;;  %v755_v41 = vmul.f32 %v1917_v6, %v1917_v6 }
 0x158   : > { %906 = vst [vmem:[%s2837_s2 + $0x138] sm:$0xff] %v1919_v7 }
 0x159   : > { %v680_v36 = vadd.f32 %v679_v32, %v1901_v62  ;;  %907 = vst [vmem:[%s2837_s2 + $0x140] sm:$0xff] %v1927_v11  ;;  %v815_v32 = vadd.f32 %v814_v49, %v752_v45  ;;  %v756_v49 = vmul.f32 %v1925_v10, %v1925_v10 }
 0x15a   : > { %908 = vst [vmem:[%s2837_s2 + $0x148] sm:$0xff] %v1935_v15 }
 0x15b   : > { %v681_v24 = vadd.f32 %v680_v36, %v1909_v2  ;;  %909 = vst [vmem:[%s2837_s2 + $0x150] sm:$0xff] %v1943_v19  ;;  %v816_v36 = vadd.f32 %v815_v32, %v753_v20  ;;  %v757_v32 = vmul.f32 %v1933_v14, %v1933_v14 }
 0x15c   : > { %910 = vst [vmem:[%s2837_s2 + $0x158] sm:$0xff] %v1951_v23 }
 0x15d   : > { %v682_v28 = vadd.f32 %v681_v24, %v1917_v6  ;;  %911 = vst [vmem:[%s2837_s2 + $0x160] sm:$0xff] %v1959_v27  ;;  %v817_v24 = vadd.f32 %v816_v36, %v754_v40  ;;  %v758_v36 = vmul.f32 %v1941_v18, %v1941_v18 }
 0x15e   : > { %912 = vst [vmem:[%s2837_s2 + $0x168] sm:$0xff] %v1967_v31 }
 0x15f   : > { %v683_v45 = vadd.f32 %v682_v28, %v1925_v10  ;;  %913 = vst [vmem:[%s2837_s2 + $0x170] sm:$0xff] %v1975_v35  ;;  %v818_v28 = vadd.f32 %v817_v24, %v755_v41  ;;  %v759_v24 = vmul.f32 %v1949_v22, %v1949_v22  ;;  %v766_v10 = vmul.f32 %v1879_v51, %v1879_v51 }
 0x160   : > { %914 = vst [vmem:[%s2837_s2 + $0x178] sm:$0xff] %v1983_v39 }
 0x161   : > { %v684_v20 = vadd.f32 %v683_v45, %v1933_v14  ;;  %915 = vst [vmem:[%s2837_s2 + $0x180] sm:$0xff] %v1865_v44  ;;  %v819_v45 = vadd.f32 %v818_v28, %v756_v49  ;;  %v760_v28 = vmul.f32 %v1957_v26, %v1957_v26  ;;  %v2891_v14 = vld [vmem:[#allocation28_spill] sm:$0xff] }
 0x162   : > { %916 = vst [vmem:[%s2837_s2 + $0x188] sm:$0xff] %v1873_v48 }
 0x163   : > { %v685_v40 = vadd.f32 %v684_v20, %v1941_v18  ;;  %917 = vst [vmem:[%s2837_s2 + $0x190] sm:$0xff] %v1881_v52  ;;  %v820_v20 = vadd.f32 %v819_v45, %v757_v32  ;;  %v761_v45 = vmul.f32 %v1965_v30, %v1965_v30  ;;  %v2889_v18 = vld [vmem:[#allocation24_spill] sm:$0xff] }
 0x164   : > { %918 = vst [vmem:[%s2837_s2 + $0x198] sm:$0xff] %v1889_v56 }
 0x165   : > { %v686_v41 = vadd.f32 %v685_v40, %v1949_v22  ;;  %919 = vst [vmem:[%s2837_s2 + $0x1a0] sm:$0xff] %v1897_v60  ;;  %v821_v40 = vadd.f32 %v820_v20, %v758_v36  ;;  %v2886_v20 = vld [vmem:[#allocation18_spill] sm:$0xff]  ;;  %v2887_v22 = vld [vmem:[#allocation20_spill] sm:$0xff] }
 0x166   : > { %920 = vst [vmem:[%s2837_s2 + $0x1a8] sm:$0xff] %v1905_v0 }
 0x167   : > { %v687_v49 = vadd.f32 %v686_v41, %v1957_v26  ;;  %921 = vst [vmem:[%s2837_s2 + $0x1b0] sm:$0xff] %v1913_v4  ;;  %v822_v41 = vadd.f32 %v821_v40, %v759_v24  ;;  %v2888_v40 = vld [vmem:[#allocation22_spill] sm:$0xff] }
 0x168   : > { %922 = vst [vmem:[%s2837_s2 + $0x1b8] sm:$0xff] %v1921_v8 }
 0x169   : > { %v688_v32 = vadd.f32 %v687_v49, %v1965_v30  ;;  %923 = vst [vmem:[%s2837_s2 + $0x1c0] sm:$0xff] %v1929_v12  ;;  %v762_v49 = vmul.f32 %v1973_v34, %v1973_v34  ;;  %v823_v26 = vadd.f32 %v822_v41, %v760_v28  ;;  %v2890_v41 = vld [vmem:[#allocation26_spill] sm:$0xff] }
 0x16a   : > { %924 = vst [vmem:[%s2837_s2 + $0x1c8] sm:$0xff] %v1937_v16 }
 0x16b   : > { %v689_v36 = vadd.f32 %v688_v32, %v1973_v34  ;;  %925 = vst [vmem:[%s2837_s2 + $0x1d0] sm:$0xff] %v2886_v20  ;;  %v763_v32 = vmul.f32 %v1981_v38, %v1981_v38  ;;  %v824_v30 = vadd.f32 %v823_v26, %v761_v45  ;;  %v765_v45 = vmul.f32 %v1871_v47, %v1871_v47 }
 0x16c   : > { %926 = vst [vmem:[%s2837_s2 + $0x1d8] sm:$0xff] %v2887_v22 }
 0x16d   : > { %v690_v24 = vadd.f32 %v689_v36, %v1981_v38  ;;  %927 = vst [vmem:[%s2837_s2 + $0x1e0] sm:$0xff] %v2888_v40  ;;  %v764_v36 = vmul.f32 %v1863_v43, %v1863_v43  ;;  %v825_v34 = vadd.f32 %v824_v30, %v762_v49  ;;  %v767_v30 = vmul.f32 %v1887_v55, %v1887_v55 }
 0x16e   : > { %928 = vst [vmem:[%s2837_s2 + $0x1e8] sm:$0xff] %v2889_v18 }
 0x16f   : > { %v691_v28 = vadd.f32 %v690_v24, %v1863_v43  ;;  %929 = vst [vmem:[%s2837_s2 + $0x1f0] sm:$0xff] %v2890_v41  ;;  %v826_v24 = vadd.f32 %v825_v34, %v763_v32  ;;  %v769_v32 = vmul.f32 %v1903_v63, %v1903_v63 }
 0x170   : > { %930 = vst [vmem:[%s2837_s2 + $0x1f8] sm:$0xff] %v2891_v14 }
 0x171   : > { %v692_v26 = vadd.f32 %v691_v28, %v1871_v47  ;;  %v827_v6 = vadd.f32 %v826_v24, %v764_v36  ;;  %v768_v28 = vmul.f32 %v1895_v59, %v1895_v59 }
 0x173   : > { %v693_v38 = vadd.f32 %v692_v26, %v1879_v51  ;;  %v828_v49 = vadd.f32 %v827_v6, %v765_v45 }
 0x175   : > { %v694_v43 = vadd.f32 %v693_v38, %v1887_v55  ;;  %v829_v62 = vadd.f32 %v828_v49, %v766_v10  ;;  %v770_v38 = vmul.f32 %v1911_v3, %v1911_v3 }
 0x177   : > { %v695_v2 = vadd.f32 %v694_v43, %v1895_v59  ;;  %v830_v26 = vadd.f32 %v829_v62, %v767_v30  ;;  %v771_v43 = vmul.f32 %v1919_v7, %v1919_v7  ;;  %v773_v30 = vmul.f32 %v1935_v15, %v1935_v15 }
 0x179   : > { %v696_v34 = vadd.f32 %v695_v2, %v1903_v63  ;;  %v831_v24 = vadd.f32 %v830_v26, %v768_v28  ;;  %v772_v2 = vmul.f32 %v1927_v11, %v1927_v11  ;;  %v774_v26 = vmul.f32 %v1943_v19, %v1943_v19 }
 0x17b   : > { %v697_v36 = vadd.f32 %v696_v34, %v1911_v3  ;;  %v832_v45 = vadd.f32 %v831_v24, %v769_v32  ;;  %v775_v24 = vmul.f32 %v1951_v23, %v1951_v23 }
 0x17d   : > { %v698_v6 = vadd.f32 %v697_v36, %v1919_v7  ;;  %v833_v49 = vadd.f32 %v832_v45, %v770_v38  ;;  %v776_v45 = vmul.f32 %v1959_v27, %v1959_v27 }
 0x17f   : > { %v699_v10 = vadd.f32 %v698_v6, %v1927_v11  ;;  %v834_v34 = vadd.f32 %v833_v49, %v771_v43  ;;  %v777_v49 = vmul.f32 %v1967_v31, %v1967_v31 }
 0x181   : > { %v700_v62 = vadd.f32 %v699_v10, %v1935_v15  ;;  %v835_v36 = vadd.f32 %v834_v34, %v772_v2  ;;  %v778_v34 = vmul.f32 %v1975_v35, %v1975_v35 }
 0x183   : > { %v701_v28 = vadd.f32 %v700_v62, %v1943_v19  ;;  %v836_v6 = vadd.f32 %v835_v36, %v773_v30  ;;  %v779_v36 = vmul.f32 %v1983_v39, %v1983_v39 }
 0x185   : > { %v702_v32 = vadd.f32 %v701_v28, %v1951_v23  ;;  %v837_v10 = vadd.f32 %v836_v6, %v774_v26  ;;  %v780_v6 = vmul.f32 %v1865_v44, %v1865_v44 }
 0x187   : > { %v703_v38 = vadd.f32 %v702_v32, %v1959_v27  ;;  %v838_v62 = vadd.f32 %v837_v10, %v775_v24  ;;  %v781_v10 = vmul.f32 %v1873_v48, %v1873_v48 }
 0x189   : > { %v704_v43 = vadd.f32 %v703_v38, %v1967_v31  ;;  %v839_v28 = vadd.f32 %v838_v62, %v776_v45  ;;  %v782_v62 = vmul.f32 %v1881_v52, %v1881_v52 }
 0x18b   : > { %v705_v2 = vadd.f32 %v704_v43, %v1975_v35  ;;  %v840_v32 = vadd.f32 %v839_v28, %v777_v49  ;;  %v783_v28 = vmul.f32 %v1889_v56, %v1889_v56 }
 0x18d   : > { %v706_v30 = vadd.f32 %v705_v2, %v1983_v39  ;;  %v841_v38 = vadd.f32 %v840_v32, %v778_v34  ;;  %v784_v32 = vmul.f32 %v1897_v60, %v1897_v60 }
 0x18f   : > { %v707_v26 = vadd.f32 %v706_v30, %v1865_v44  ;;  %v842_v43 = vadd.f32 %v841_v38, %v779_v36  ;;  %v785_v38 = vmul.f32 %v1905_v0, %v1905_v0 }
 0x191   : > { %v708_v24 = vadd.f32 %v707_v26, %v1873_v48  ;;  %v843_v2 = vadd.f32 %v842_v43, %v780_v6  ;;  %v786_v43 = vmul.f32 %v1913_v4, %v1913_v4 }
 0x193   : > { %v709_v45 = vadd.f32 %v708_v24, %v1881_v52  ;;  %v844_v30 = vadd.f32 %v843_v2, %v781_v10  ;;  %v787_v2 = vmul.f32 %v1921_v8, %v1921_v8 }
 0x195   : > { %v710_v49 = vadd.f32 %v709_v45, %v1889_v56  ;;  %v845_v26 = vadd.f32 %v844_v30, %v782_v62  ;;  %v788_v30 = vmul.f32 %v1929_v12, %v1929_v12 }
 0x197   : > { %v711_v34 = vadd.f32 %v710_v49, %v1897_v60  ;;  %v846_v24 = vadd.f32 %v845_v26, %v783_v28  ;;  %v789_v26 = vmul.f32 %v1937_v16, %v1937_v16 }
 0x199   : > { %v712_v36 = vadd.f32 %v711_v34, %v1905_v0  ;;  %v847_v45 = vadd.f32 %v846_v24, %v784_v32  ;;  %v790_v24 = vmul.f32 %v2886_v20, %v2886_v20 }
 0x19b   : > { %v713_v6 = vadd.f32 %v712_v36, %v1913_v4  ;;  %v848_v49 = vadd.f32 %v847_v45, %v785_v38  ;;  %v791_v45 = vmul.f32 %v2887_v22, %v2887_v22 }
 0x19d   : > { %v714_v10 = vadd.f32 %v713_v6, %v1921_v8  ;;  %v849_v34 = vadd.f32 %v848_v49, %v786_v43  ;;  %v792_v49 = vmul.f32 %v2888_v40, %v2888_v40 }
 0x19f   : > { %v715_v62 = vadd.f32 %v714_v10, %v1929_v12  ;;  %v850_v36 = vadd.f32 %v849_v34, %v787_v2  ;;  %v793_v34 = vmul.f32 %v2889_v18, %v2889_v18 }
 0x1a1   : > { %v716_v28 = vadd.f32 %v715_v62, %v1937_v16  ;;  %v851_v6 = vadd.f32 %v850_v36, %v788_v30  ;;  %v794_v30 = vmul.f32 %v2890_v41, %v2890_v41 }
 0x1a3   : > { %v717_v32 = vadd.f32 %v716_v28, %v2886_v20  ;;  %v852_v10 = vadd.f32 %v851_v6, %v789_v26  ;;  %v795_v26 = vmul.f32 %v2891_v14, %v2891_v14 }
 0x1a5   : > { %v718_v38 = vadd.f32 %v717_v32, %v2887_v22  ;;  %v853_v62 = vadd.f32 %v852_v10, %v790_v24 }
 0x1a7   : > { %v719_v43 = vadd.f32 %v718_v38, %v2888_v40  ;;  %v854_v28 = vadd.f32 %v853_v62, %v791_v45 }
 0x1a9   : > { %v720_v2 = vadd.f32 %v719_v43, %v2889_v18  ;;  %v855_v36 = vadd.f32 %v854_v28, %v792_v49 }
 0x1ab   : > { %v721_v20 = vadd.f32 %v720_v2, %v2890_v41  ;;  %v856_v32 = vadd.f32 %v855_v36, %v793_v34  ;;  %v659_v2 = vld [vmem:[#allocation2] sm:$0x1] }
 0x1ad   : > { %v722_v22 = vadd.f32 %v721_v20, %v2891_v14  ;;  %v857_v24 = vadd.f32 %v856_v32, %v794_v30  ;;  %v731_v20 = vld [vmem:[#allocation3] sm:$0x1] }
 0x1af   : > { %v723_v40 = vrot.slane %v722_v22, 4  ;;  %v858_v38 = vadd.f32 %v857_v24, %v795_v26 }
 0x1b1   : > { %v724_v6 = vadd.f32 %v723_v40, %v722_v22  ;;  %v859_v43 = vrot.slane %v858_v38, 4 }
 0x1b3   : > { %v725_v10 = vrot.slane %v724_v6, 2  ;;  %v860_v45 = vadd.f32 %v859_v43, %v858_v38 }
 0x1b5   : > { %v726_v18 = vadd.f32 %v725_v10, %v724_v6  ;;  %v861_v16 = vrot.slane %v860_v45, 2 }
 0x1b7   : > { %v727_v62 = vrot.slane %v726_v18, 1  ;;  %v862_v41 = vadd.f32 %v861_v16, %v860_v45 }
 0x1b9   : > { %v728_v12 = vadd.f32 %v727_v62, %v726_v18  ;;  %v863_v28 = vrot.slane %v862_v41, 1 }
 0x1bb   : > { %v729_v49 = vadd.f32 %v728_v12, %v659_v2  ;;  %v864_v8 = vadd.f32 %v863_v28, %v862_v41 }
 0x1bd   : > { %730 = vst [vmem:[#allocation2] sm:$0x1] %v729_v49  ;;  %v865_v14 = vadd.f32 %v864_v8, %v731_v20 }
 0x1bf   : > { %866 = vst [vmem:[#allocation3] sm:$0x1] %v865_v14 }
 0x1c0 PF: > { %p931_p6 = scmp.eq.s32.totalorder %s1692_s9, 1 }
 0x1c2   : > { %935 = sbr.rel (!%p931_p6) target bundleno = 480 (0x1e0), region = 40 }
 0x1c4   : > { %v936_v34 = vld [vmem:[#allocation2] sm:$0x1] (%p931_p6) }
 0x1c5   : > { %v937_v36 = vmul.f32 (%p931_p6), 0.001953125, %v936_v34 }
 0x1c6   : > { %v938_v30 = vld [vmem:[#allocation3] sm:$0x1] (%p931_p6) }
 0x1c7   : > { %v939_v22 = vmul.f32 0.001953125, %v938_v30  ;;  %v940_v26 = vmul.f32 %v937_v36, %v937_v36  ;;  %942 = vst [vmem:[#allocation4] sm:$0x1] %v937_v36 }
 0x1c9   : > { %v941_v32 = vsub.f32 %v939_v22, %v940_v26 }
 0x1cb   : > { %v943_v40 = vadd.f32 1e-05, %v941_v32 }
 0x1cd   : > { %1674 = vrsqrt.f32 %v943_v40  ;;  %vm950_vm0 = vweird.f32 %v943_v40 }
 0x1d3   : > { %v1675_v12 = vpop.eup %1674 }
 0x1d4   : > { %v945_v16 = vmul.f32 %v1675_v12, %v943_v40  ;;  %vm951_vm1 = vweird.f32 %v1675_v12 }
 0x1d5   : > { %vm952_vm2 = vmor %vm950_vm0, %vm951_vm1 }
 0x1d6   : > { %v946_v24 = vmul.f32 %v1675_v12, %v945_v16 }
 0x1d8   : > { %v947_v6 = vmul.f32 0.5, %v946_v24 }
 0x1da   : > { %v948_v8 = vsub.f32 1.5, %v947_v6 }
 0x1dc   : > { %v949_v38 = vmul.f32 %v1675_v12, %v948_v8 }
 0x1de   : > { %v953_v10 = vsel %vm952_vm2, %v1675_v12, %v949_v38 }
 0x1df   : > { %954 = vst [vmem:[#allocation4 + $0x1] sm:$0x1] %v953_v10 }
 0x1e0 PF: > { %p1578_p7 = scmp.ne.s32.totalorder %s1692_s9, 1 }
 0x1e2   : > { %957 = sbr.rel (%p1578_p7) target bundleno = 572 (0x23c), region = 44 }
 0x1e7   : > { %v2438_v43 = vld [vmem:[#allocation4] ss:$0 sm:$0xff]  ;;  %v2440_v18 = vld [vmem:[#allocation4 + $0x1] ss:$0 sm:$0xff]  ;;  %v2892_v45 = vld [vmem:[#allocation5_spill] sm:$0xff] }
 0x1e8   : > { %v960_v62 = vsub.f32 %v2892_v45, %v2438_v43  ;;  %v2893_v2 = vld [vmem:[#allocation7_spill] sm:$0xff]  ;;  %v2894_v49 = vld [vmem:[#allocation8_spill] sm:$0xff]  ;;  %v963_v20 = vsub.f32 %v1883_v53, %v2438_v43  ;;  %v964_v14 = vsub.f32 %v1891_v57, %v2438_v43  ;;  %v965_v34 = vsub.f32 %v1899_v61, %v2438_v43 }
 0x1e9   : > { %v961_v41 = vsub.f32 %v2893_v2, %v2438_v43  ;;  %v962_v28 = vsub.f32 %v2894_v49, %v2438_v43  ;;  %v966_v30 = vsub.f32 %v1907_v1, %v2438_v43  ;;  %v967_v36 = vsub.f32 %v1915_v5, %v2438_v43 }
 0x1ea   : > { %v1026_v22 = vmul.f32 %v2440_v18, %v960_v62  ;;  %v1029_v53 = vmul.f32 %v2440_v18, %v963_v20  ;;  %v1030_v40 = vmul.f32 %v2440_v18, %v964_v14  ;;  %v1031_v57 = vmul.f32 %v2440_v18, %v965_v34 }
 0x1eb   : > { %v1027_v26 = vmul.f32 %v2440_v18, %v961_v41  ;;  %v1028_v32 = vmul.f32 %v2440_v18, %v962_v28  ;;  %v1032_v61 = vmul.f32 %v2440_v18, %v966_v30  ;;  %v1033_v12 = vmul.f32 %v2440_v18, %v967_v36 }
 0x1ec   : > { %vm1090_vm3 = vcmp.ge.f32.partialorder %v1026_v22, 0.0  ;;  %v1154_v1 = vmul.f32 0.01, %v1026_v22  ;;  %vm1093_vm6 = vcmp.ge.f32.partialorder %v1029_v53, 0.0  ;;  %v1157_v24 = vmul.f32 0.01, %v1029_v53 }
 0x1ed   : > { %vm1091_vm4 = vcmp.ge.f32.partialorder %v1027_v26, 0.0  ;;  %v1155_v5 = vmul.f32 0.01, %v1027_v26  ;;  %vm1092_vm5 = vcmp.ge.f32.partialorder %v1028_v32, 0.0  ;;  %v1156_v16 = vmul.f32 0.01, %v1028_v32 }
 0x1ee   : > { %v1218_v6 = vsel %vm1090_vm3, %v1026_v22, %v1154_v1  ;;  %vm1094_vm7 = vcmp.ge.f32.partialorder %v1030_v40, 0.0  ;;  %v1158_v38 = vmul.f32 0.01, %v1030_v40  ;;  %v1221_v45 = vsel %vm1093_vm6, %v1029_v53, %v1157_v24 }
 0x1ef   : > { %v1219_v8 = vsel %vm1091_vm4, %v1027_v26, %v1155_v5  ;;  %1282 = vst [vmem:[%s2837_s2] sm:$0xff] %v1218_v6  ;;  %v1220_v10 = vsel %vm1092_vm5, %v1028_v32, %v1156_v16  ;;  %vm1095_vm8 = vcmp.ge.f32.partialorder %v1031_v57, 0.0  ;;  %v1159_v62 = vmul.f32 0.01, %v1031_v57 }
 0x1f0   : > { %1283 = vst [vmem:[%s2837_s2 + $0x8] sm:$0xff] %v1219_v8  ;;  %v1222_v2 = vsel %vm1094_vm7, %v1030_v40, %v1158_v38  ;;  %vm1096_vm9 = vcmp.ge.f32.partialorder %v1032_v61, 0.0  ;;  %v1160_v41 = vmul.f32 0.01, %v1032_v61  ;;  %vm1097_vm10 = vcmp.ge.f32.partialorder %v1033_v12, 0.0 }
 0x1f1   : > { %1284 = vst [vmem:[%s2837_s2 + $0x10] sm:$0xff] %v1220_v10  ;;  %v1223_v49 = vsel %vm1095_vm8, %v1031_v57, %v1159_v62  ;;  %v1161_v28 = vmul.f32 0.01, %v1033_v12  ;;  %v968_v20 = vsub.f32 %v1923_v9, %v2438_v43  ;;  %v969_v14 = vsub.f32 %v1931_v13, %v2438_v43 }
 0x1f2   : > { %1285 = vst [vmem:[%s2837_s2 + $0x18] sm:$0xff] %v1221_v45  ;;  %v1224_v34 = vsel %vm1096_vm9, %v1032_v61, %v1160_v41  ;;  %v970_v30 = vsub.f32 %v1939_v17, %v2438_v43  ;;  %v971_v36 = vsub.f32 %v1947_v21, %v2438_v43  ;;  %v972_v22 = vsub.f32 %v1955_v25, %v2438_v43 }
 0x1f3   : > { %1286 = vst [vmem:[%s2837_s2 + $0x20] sm:$0xff] %v1222_v2  ;;  %v1225_v9 = vsel %vm1097_vm10, %v1033_v12, %v1161_v28  ;;  %v1034_v13 = vmul.f32 %v2440_v18, %v968_v20  ;;  %v1035_v26 = vmul.f32 %v2440_v18, %v969_v14  ;;  %v973_v32 = vsub.f32 %v1963_v29, %v2438_v43 }
 0x1f4   : > { %1287 = vst [vmem:[%s2837_s2 + $0x28] sm:$0xff] %v1223_v49  ;;  %v1036_v17 = vmul.f32 %v2440_v18, %v970_v30  ;;  %v1037_v21 = vmul.f32 %v2440_v18, %v971_v36  ;;  %v1038_v25 = vmul.f32 %v2440_v18, %v972_v22  ;;  %v974_v53 = vsub.f32 %v1971_v33, %v2438_v43  ;;  %v2896_v36 = vld [vmem:[#allocation10_spill] sm:$0xff] }
 0x1f5   : > { %1288 = vst [vmem:[%s2837_s2 + $0x30] sm:$0xff] %v1224_v34  ;;  %vm1098_vm11 = vcmp.ge.f32.partialorder %v1034_v13, 0.0  ;;  %v1162_v40 = vmul.f32 0.01, %v1034_v13  ;;  %vm1099_vm12 = vcmp.ge.f32.partialorder %v1035_v26, 0.0  ;;  %v1039_v29 = vmul.f32 %v2440_v18, %v973_v32  ;;  %v2895_v34 = vld [vmem:[#allocation9_spill] sm:$0xff] }
 0x1f6   : > { %1289 = vst [vmem:[%s2837_s2 + $0x38] sm:$0xff] %v1225_v9  ;;  %v1163_v57 = vmul.f32 0.01, %v1035_v26  ;;  %vm1100_vm13 = vcmp.ge.f32.partialorder %v1036_v17, 0.0  ;;  %v1164_v61 = vmul.f32 0.01, %v1036_v17  ;;  %v1040_v12 = vmul.f32 %v2440_v18, %v974_v53 }
 0x1f7   : > { %v1226_v1 = vsel %vm1098_vm11, %v1034_v13, %v1162_v40  ;;  %vm1101_vm14 = vcmp.ge.f32.partialorder %v1037_v21, 0.0  ;;  %v1165_v33 = vmul.f32 0.01, %v1037_v21  ;;  %vm1102_vm15 = vcmp.ge.f32.partialorder %v1038_v25, 0.0 }
 0x1f8   : > { %1290 = vst [vmem:[%s2837_s2 + $0x40] sm:$0xff] %v1226_v1  ;;  %v1227_v5 = vsel %vm1099_vm12, %v1035_v26, %v1163_v57  ;;  %v1228_v16 = vsel %vm1100_vm13, %v1036_v17, %v1164_v61  ;;  %v1166_v24 = vmul.f32 0.01, %v1038_v25  ;;  %vm1103_vm0 = vcmp.ge.f32.partialorder %v1039_v29, 0.0 }
 0x1f9   : > { %1291 = vst [vmem:[%s2837_s2 + $0x48] sm:$0xff] %v1227_v5  ;;  %v1229_v6 = vsel %vm1101_vm14, %v1037_v21, %v1165_v33  ;;  %v1167_v8 = vmul.f32 0.01, %v1039_v29  ;;  %vm1104_vm1 = vcmp.ge.f32.partialorder %v1040_v12, 0.0  ;;  %v1168_v38 = vmul.f32 0.01, %v1040_v12 }
 0x1fa   : > { %1292 = vst [vmem:[%s2837_s2 + $0x50] sm:$0xff] %v1228_v16  ;;  %v1230_v10 = vsel %vm1102_vm15, %v1038_v25, %v1166_v24  ;;  %v975_v45 = vsub.f32 %v1979_v37, %v2438_v43  ;;  %v976_v62 = vsub.f32 %v1861_v42, %v2438_v43  ;;  %v977_v2 = vsub.f32 %v1869_v46, %v2438_v43  ;;  %v2897_v33 = vld [vmem:[#allocation11_spill] sm:$0xff] }
 0x1fb   : > { %1293 = vst [vmem:[%s2837_s2 + $0x58] sm:$0xff] %v1229_v6  ;;  %v1231_v41 = vsel %vm1103_vm0, %v1039_v29, %v1167_v8  ;;  %v1232_v49 = vsel %vm1104_vm1, %v1040_v12, %v1168_v38  ;;  %v978_v28 = vsub.f32 %v1877_v50, %v2438_v43  ;;  %v979_v20 = vsub.f32 %v1885_v54, %v2438_v43  ;;  %v2898_v6 = vld [vmem:[#allocation13_spill] sm:$0xff]  ;;  %v2899_v38 = vld [vmem:[#allocation15_spill] sm:$0xff] }
 0x1fc   : > { %1294 = vst [vmem:[%s2837_s2 + $0x60] sm:$0xff] %v1230_v10  ;;  %v1041_v42 = vmul.f32 %v2440_v18, %v975_v45  ;;  %v1042_v46 = vmul.f32 %v2440_v18, %v976_v62  ;;  %v1043_v37 = vmul.f32 %v2440_v18, %v977_v2  ;;  %v980_v14 = vsub.f32 %v1893_v58, %v2438_v43  ;;  %v2900_v2 = vld [vmem:[#allocation17_spill] sm:$0xff] }
 0x1fd   : > { %1295 = vst [vmem:[%s2837_s2 + $0x68] sm:$0xff] %v1231_v41  ;;  %v1044_v50 = vmul.f32 %v2440_v18, %v978_v28  ;;  %v1045_v54 = vmul.f32 %v2440_v18, %v979_v20  ;;  %v981_v30 = vsub.f32 %v2895_v34, %v2438_v43  ;;  %v982_v22 = vsub.f32 %v2896_v36, %v2438_v43 }
 0x1fe   : > { %1296 = vst [vmem:[%s2837_s2 + $0x70] sm:$0xff] %v1232_v49  ;;  %vm1105_vm2 = vcmp.ge.f32.partialorder %v1041_v42, 0.0  ;;  %v1169_v58 = vmul.f32 0.01, %v1041_v42  ;;  %vm1106_vm3 = vcmp.ge.f32.partialorder %v1042_v46, 0.0  ;;  %vm1107_vm4 = vcmp.ge.f32.partialorder %v1043_v37, 0.0 }
 0x1ff   : > { %v1170_v9 = vmul.f32 0.01, %v1042_v46  ;;  %v1171_v13 = vmul.f32 0.01, %v1043_v37  ;;  %vm1108_vm5 = vcmp.ge.f32.partialorder %v1044_v50, 0.0  ;;  %vm1109_vm6 = vcmp.ge.f32.partialorder %v1045_v54, 0.0 }
 0x200   : > { %v1233_v26 = vsel %vm1105_vm2, %v1041_v42, %v1169_v58  ;;  %v1172_v32 = vmul.f32 0.01, %v1044_v50  ;;  %v1173_v17 = vmul.f32 0.01, %v1045_v54  ;;  %v1046_v21 = vmul.f32 %v2440_v18, %v980_v14  ;;  %v2901_v49 = vld [vmem:[#allocation19_spill] sm:$0xff] }
 0x201   : > { %1297 = vst [vmem:[%s2837_s2 + $0x78] sm:$0xff] %v1233_v26  ;;  %v1234_v25 = vsel %vm1106_vm3, %v1042_v46, %v1170_v9  ;;  %v1235_v53 = vsel %vm1107_vm4, %v1043_v37, %v1171_v13  ;;  %v1047_v40 = vmul.f32 %v2440_v18, %v981_v30  ;;  %v1048_v29 = vmul.f32 %v2440_v18, %v982_v22  ;;  %v2902_v37 = vld [vmem:[#allocation21_spill] sm:$0xff] }
 0x202   : > { %1298 = vst [vmem:[%s2837_s2 + $0x80] sm:$0xff] %v1234_v25  ;;  %v1236_v57 = vsel %vm1108_vm5, %v1044_v50, %v1172_v32  ;;  %v1237_v61 = vsel %vm1109_vm6, %v1045_v54, %v1173_v17  ;;  %vm1110_vm7 = vcmp.ge.f32.partialorder %v1046_v21, 0.0  ;;  %v1174_v12 = vmul.f32 0.01, %v1046_v21  ;;  %v2903_v25 = vld [vmem:[#allocation23_spill] sm:$0xff] }
 0x203   : > { %1299 = vst [vmem:[%s2837_s2 + $0x88] sm:$0xff] %v1235_v53  ;;  %vm1111_vm8 = vcmp.ge.f32.partialorder %v1047_v40, 0.0  ;;  %v1175_v1 = vmul.f32 0.01, %v1047_v40  ;;  %vm1112_vm9 = vcmp.ge.f32.partialorder %v1048_v29, 0.0  ;;  %v983_v5 = vsub.f32 %v2897_v33, %v2438_v43 }
 0x204   : > { %1300 = vst [vmem:[%s2837_s2 + $0x90] sm:$0xff] %v1236_v57  ;;  %v1238_v16 = vsel %vm1110_vm7, %v1046_v21, %v1174_v12  ;;  %v1176_v24 = vmul.f32 0.01, %v1048_v29  ;;  %v984_v8 = vsub.f32 %v2898_v6, %v2438_v43  ;;  %v985_v10 = vsub.f32 %v2899_v38, %v2438_v43 }
 0x205   : > { %1301 = vst [vmem:[%s2837_s2 + $0x98] sm:$0xff] %v1237_v61  ;;  %v1239_v45 = vsel %vm1111_vm8, %v1047_v40, %v1175_v1  ;;  %v1049_v62 = vmul.f32 %v2440_v18, %v983_v5  ;;  %v986_v41 = vsub.f32 %v2900_v2, %v2438_v43  ;;  %v987_v28 = vsub.f32 %v2901_v49, %v2438_v43  ;;  %v2905_v61 = vld [vmem:[#allocation27_spill] sm:$0xff]  ;;  %v2906_v1 = vld [vmem:[#allocation6_spill] sm:$0xff] }
 0x206   : > { %1302 = vst [vmem:[%s2837_s2 + $0xa0] sm:$0xff] %v1238_v16  ;;  %v1240_v20 = vsel %vm1112_vm9, %v1048_v29, %v1176_v24  ;;  %v1050_v42 = vmul.f32 %v2440_v18, %v984_v8  ;;  %v1051_v46 = vmul.f32 %v2440_v18, %v985_v10  ;;  %v988_v14 = vsub.f32 %v2902_v37, %v2438_v43  ;;  %v2904_v29 = vld [vmem:[#allocation25_spill] sm:$0xff] }
 0x207   : > { %1303 = vst [vmem:[%s2837_s2 + $0xa8] sm:$0xff] %v1239_v45  ;;  %vm1113_vm10 = vcmp.ge.f32.partialorder %v1049_v62, 0.0  ;;  %v1177_v50 = vmul.f32 0.01, %v1049_v62  ;;  %v1052_v54 = vmul.f32 %v2440_v18, %v986_v41  ;;  %v1053_v34 = vmul.f32 %v2440_v18, %v987_v28 }
 0x208   : > { %1304 = vst [vmem:[%s2837_s2 + $0xb0] sm:$0xff] %v1240_v20  ;;  %vm1114_vm11 = vcmp.ge.f32.partialorder %v1050_v42, 0.0  ;;  %v1178_v30 = vmul.f32 0.01, %v1050_v42  ;;  %vm1115_vm12 = vcmp.ge.f32.partialorder %v1051_v46, 0.0  ;;  %v1054_v36 = vmul.f32 %v2440_v18, %v988_v14 }
 0x209   : > { %v1241_v22 = vsel %vm1113_vm10, %v1049_v62, %v1177_v50  ;;  %v1179_v58 = vmul.f32 0.01, %v1051_v46  ;;  %vm1116_vm13 = vcmp.ge.f32.partialorder %v1052_v54, 0.0  ;;  %v1180_v9 = vmul.f32 0.01, %v1052_v54 }
 0x20a   : > { %1305 = vst [vmem:[%s2837_s2 + $0xb8] sm:$0xff] %v1241_v22  ;;  %v1242_v13 = vsel %vm1114_vm11, %v1050_v42, %v1178_v30  ;;  %vm1117_vm14 = vcmp.ge.f32.partialorder %v1053_v34, 0.0  ;;  %v1181_v26 = vmul.f32 0.01, %v1053_v34  ;;  %vm1118_vm15 = vcmp.ge.f32.partialorder %v1054_v36, 0.0 }
 0x20b   : > { %1306 = vst [vmem:[%s2837_s2 + $0xc0] sm:$0xff] %v1242_v13  ;;  %v1243_v32 = vsel %vm1115_vm12, %v1051_v46, %v1179_v58  ;;  %v1244_v17 = vsel %vm1116_vm13, %v1052_v54, %v1180_v9  ;;  %v1182_v21 = vmul.f32 0.01, %v1054_v36  ;;  %v989_v53 = vsub.f32 %v2903_v25, %v2438_v43 }
 0x20c   : > { %1307 = vst [vmem:[%s2837_s2 + $0xc8] sm:$0xff] %v1243_v32  ;;  %v1245_v40 = vsel %vm1117_vm14, %v1053_v34, %v1181_v26  ;;  %v990_v57 = vsub.f32 %v2904_v29, %v2438_v43  ;;  %v991_v12 = vsub.f32 %v2905_v61, %v2438_v43  ;;  %v992_v33 = vsub.f32 %v2906_v1, %v2438_v43 }
 0x20d   : > { %1308 = vst [vmem:[%s2837_s2 + $0xd0] sm:$0xff] %v1244_v17  ;;  %v1246_v5 = vsel %vm1118_vm15, %v1054_v36, %v1182_v21  ;;  %v1055_v16 = vmul.f32 %v2440_v18, %v989_v53  ;;  %v993_v24 = vsub.f32 %v1871_v47, %v2438_v43  ;;  %v994_v6 = vsub.f32 %v1879_v51, %v2438_v43 }
 0x20e   : > { %1309 = vst [vmem:[%s2837_s2 + $0xd8] sm:$0xff] %v1245_v40  ;;  %v1056_v8 = vmul.f32 %v2440_v18, %v990_v57  ;;  %v1057_v38 = vmul.f32 %v2440_v18, %v991_v12  ;;  %v1058_v10 = vmul.f32 %v2440_v18, %v992_v33  ;;  %v995_v45 = vsub.f32 %v1887_v55, %v2438_v43 }
 0x20f   : > { %1310 = vst [vmem:[%s2837_s2 + $0xe0] sm:$0xff] %v1246_v5  ;;  %vm1119_vm0 = vcmp.ge.f32.partialorder %v1055_v16, 0.0  ;;  %v1183_v47 = vmul.f32 0.01, %v1055_v16  ;;  %v1059_v51 = vmul.f32 %v2440_v18, %v993_v24  ;;  %v1060_v62 = vmul.f32 %v2440_v18, %v994_v6 }
 0x210   : > { %vm1120_vm1 = vcmp.ge.f32.partialorder %v1056_v8, 0.0  ;;  %v1184_v2 = vmul.f32 0.01, %v1056_v8  ;;  %vm1121_vm2 = vcmp.ge.f32.partialorder %v1057_v38, 0.0  ;;  %v1185_v41 = vmul.f32 0.01, %v1057_v38 }
 0x211   : > { %v1247_v49 = vsel %vm1119_vm0, %v1055_v16, %v1183_v47  ;;  %vm1122_vm3 = vcmp.ge.f32.partialorder %v1058_v10, 0.0  ;;  %v1186_v28 = vmul.f32 0.01, %v1058_v10  ;;  %vm1123_vm4 = vcmp.ge.f32.partialorder %v1059_v51, 0.0 }
 0x212   : > { %1311 = vst [vmem:[%s2837_s2 + $0xe8] sm:$0xff] %v1247_v49  ;;  %v1248_v55 = vsel %vm1120_vm1, %v1056_v8, %v1184_v2  ;;  %v1249_v20 = vsel %vm1121_vm2, %v1057_v38, %v1185_v41  ;;  %v1187_v42 = vmul.f32 0.01, %v1059_v51  ;;  %vm1124_vm5 = vcmp.ge.f32.partialorder %v1060_v62, 0.0 }
 0x213   : > { %1312 = vst [vmem:[%s2837_s2 + $0xf0] sm:$0xff] %v1248_v55  ;;  %v1250_v46 = vsel %vm1122_vm3, %v1058_v10, %v1186_v28  ;;  %v1188_v37 = vmul.f32 0.01, %v1060_v62  ;;  %v1061_v14 = vmul.f32 %v2440_v18, %v995_v45  ;;  %v996_v50 = vsub.f32 %v1895_v59, %v2438_v43 }
 0x214   : > { %1313 = vst [vmem:[%s2837_s2 + $0xf8] sm:$0xff] %v1249_v20  ;;  %v1251_v54 = vsel %vm1123_vm4, %v1059_v51, %v1187_v42  ;;  %v997_v34 = vsub.f32 %v1903_v63, %v2438_v43  ;;  %v998_v30 = vsub.f32 %v1911_v3, %v2438_v43  ;;  %v999_v36 = vsub.f32 %v1919_v7, %v2438_v43 }
 0x215   : > { %1314 = vst [vmem:[%s2837_s2 + $0x100] sm:$0xff] %v1250_v46  ;;  %v1252_v22 = vsel %vm1124_vm5, %v1060_v62, %v1188_v37  ;;  %vm1125_vm6 = vcmp.ge.f32.partialorder %v1061_v14, 0.0  ;;  %v1189_v59 = vmul.f32 0.01, %v1061_v14  ;;  %v1062_v58 = vmul.f32 %v2440_v18, %v996_v50 }
 0x216   : > { %1315 = vst [vmem:[%s2837_s2 + $0x108] sm:$0xff] %v1251_v54  ;;  %v1063_v63 = vmul.f32 %v2440_v18, %v997_v34  ;;  %v1064_v3 = vmul.f32 %v2440_v18, %v998_v30  ;;  %v1065_v9 = vmul.f32 %v2440_v18, %v999_v36  ;;  %v1000_v7 = vsub.f32 %v1927_v11, %v2438_v43 }
 0x217   : > { %1316 = vst [vmem:[%s2837_s2 + $0x110] sm:$0xff] %v1252_v22  ;;  %v1253_v13 = vsel %vm1125_vm6, %v1061_v14, %v1189_v59  ;;  %vm1126_vm7 = vcmp.ge.f32.partialorder %v1062_v58, 0.0  ;;  %v1190_v26 = vmul.f32 0.01, %v1062_v58  ;;  %v1001_v32 = vsub.f32 %v1935_v15, %v2438_v43 }
 0x218   : > { %1317 = vst [vmem:[%s2837_s2 + $0x118] sm:$0xff] %v1253_v13  ;;  %vm1127_vm8 = vcmp.ge.f32.partialorder %v1063_v63, 0.0  ;;  %v1191_v17 = vmul.f32 0.01, %v1063_v63  ;;  %vm1128_vm9 = vcmp.ge.f32.partialorder %v1064_v3, 0.0  ;;  %vm1129_vm10 = vcmp.ge.f32.partialorder %v1065_v9, 0.0 }
 0x219   : > { %v1254_v21 = vsel %vm1126_vm7, %v1062_v58, %v1190_v26  ;;  %v1192_v11 = vmul.f32 0.01, %v1064_v3  ;;  %v1193_v25 = vmul.f32 0.01, %v1065_v9  ;;  %v1066_v53 = vmul.f32 %v2440_v18, %v1000_v7  ;;  %v2908_v13 = vld [vmem:[#allocation14_spill] sm:$0xff] }
 0x21a   : > { %1318 = vst [vmem:[%s2837_s2 + $0x120] sm:$0xff] %v1254_v21  ;;  %v1255_v40 = vsel %vm1127_vm8, %v1063_v63, %v1191_v17  ;;  %v1067_v15 = vmul.f32 %v2440_v18, %v1001_v32  ;;  %v1002_v29 = vsub.f32 %v1943_v19, %v2438_v43  ;;  %v1003_v57 = vsub.f32 %v1951_v23, %v2438_v43 }
 0x21b   : > { %1319 = vst [vmem:[%s2837_s2 + $0x128] sm:$0xff] %v1255_v40  ;;  %v1256_v61 = vsel %vm1128_vm9, %v1064_v3, %v1192_v11  ;;  %v1257_v12 = vsel %vm1129_vm10, %v1065_v9, %v1193_v25  ;;  %vm1130_vm11 = vcmp.ge.f32.partialorder %v1066_v53, 0.0  ;;  %v1194_v1 = vmul.f32 0.01, %v1066_v53 }
 0x21c   : > { %1320 = vst [vmem:[%s2837_s2 + $0x130] sm:$0xff] %v1256_v61  ;;  %vm1131_vm12 = vcmp.ge.f32.partialorder %v1067_v15, 0.0  ;;  %v1195_v33 = vmul.f32 0.01, %v1067_v15  ;;  %v1068_v5 = vmul.f32 %v2440_v18, %v1002_v29  ;;  %v1069_v19 = vmul.f32 %v2440_v18, %v1003_v57 }
 0x21d   : > { %1321 = vst [vmem:[%s2837_s2 + $0x138] sm:$0xff] %v1257_v12  ;;  %v1258_v23 = vsel %vm1130_vm11, %v1066_v53, %v1194_v1  ;;  %v1004_v16 = vsub.f32 %v1959_v27, %v2438_v43  ;;  %v1005_v24 = vsub.f32 %v1967_v31, %v2438_v43  ;;  %v1006_v6 = vsub.f32 %v1975_v35, %v2438_v43  ;;  %v2909_v1 = vld [vmem:[#allocation16_spill] sm:$0xff] }
 0x21e   : > { %1322 = vst [vmem:[%s2837_s2 + $0x140] sm:$0xff] %v1258_v23  ;;  %v1259_v8 = vsel %vm1131_vm12, %v1067_v15, %v1195_v33  ;;  %vm1132_vm13 = vcmp.ge.f32.partialorder %v1068_v5, 0.0  ;;  %v1196_v38 = vmul.f32 0.01, %v1068_v5  ;;  %vm1133_vm14 = vcmp.ge.f32.partialorder %v1069_v19, 0.0 }
 0x21f   : > { %1323 = vst [vmem:[%s2837_s2 + $0x148] sm:$0xff] %v1259_v8  ;;  %v1197_v10 = vmul.f32 0.01, %v1069_v19  ;;  %v1070_v27 = vmul.f32 %v2440_v18, %v1004_v16  ;;  %v1071_v31 = vmul.f32 %v2440_v18, %v1005_v24  ;;  %v1072_v45 = vmul.f32 %v2440_v18, %v1006_v6  ;;  %v2911_v16 = vld [vmem:[#allocation20_spill] sm:$0xff]  ;;  %v2912_v6 = vld [vmem:[#allocation22_spill] sm:$0xff] }
 0x220   : > { %v1260_v35 = vsel %vm1132_vm13, %v1068_v5, %v1196_v38  ;;  %v1007_v47 = vsub.f32 %v1983_v39, %v2438_v43  ;;  %v1008_v51 = vsub.f32 %v1865_v44, %v2438_v43  ;;  %v1009_v62 = vsub.f32 %v1873_v48, %v2438_v43 }
 0x221   : > { %1324 = vst [vmem:[%s2837_s2 + $0x150] sm:$0xff] %v1260_v35  ;;  %v1261_v2 = vsel %vm1133_vm14, %v1069_v19, %v1197_v10  ;;  %vm1134_vm15 = vcmp.ge.f32.partialorder %v1070_v27, 0.0  ;;  %v1198_v41 = vmul.f32 0.01, %v1070_v27  ;;  %vm1135_vm0 = vcmp.ge.f32.partialorder %v1071_v31, 0.0  ;;  %v2910_v19 = vld [vmem:[#allocation18_spill] sm:$0xff] }
 0x222   : > { %1325 = vst [vmem:[%s2837_s2 + $0x158] sm:$0xff] %v1261_v2  ;;  %v1199_v49 = vmul.f32 0.01, %v1071_v31  ;;  %vm1136_vm1 = vcmp.ge.f32.partialorder %v1072_v45, 0.0  ;;  %v1200_v39 = vmul.f32 0.01, %v1072_v45  ;;  %v1073_v44 = vmul.f32 %v2440_v18, %v1007_v47 }
 0x223   : > { %v1262_v28 = vsel %vm1134_vm15, %v1070_v27, %v1198_v41  ;;  %v1074_v48 = vmul.f32 %v2440_v18, %v1008_v51  ;;  %v1075_v55 = vmul.f32 %v2440_v18, %v1009_v62  ;;  %v1010_v20 = vsub.f32 %v1881_v52, %v2438_v43  ;;  %v2913_v27 = vld [vmem:[#allocation24_spill] sm:$0xff] }
 0x224   : > { %1326 = vst [vmem:[%s2837_s2 + $0x160] sm:$0xff] %v1262_v28  ;;  %v1263_v42 = vsel %vm1135_vm0, %v1071_v31, %v1199_v49  ;;  %v1264_v46 = vsel %vm1136_vm1, %v1072_v45, %v1200_v39  ;;  %vm1137_vm2 = vcmp.ge.f32.partialorder %v1073_v44, 0.0  ;;  %v1201_v37 = vmul.f32 0.01, %v1073_v44  ;;  %v2914_v45 = vld [vmem:[#allocation26_spill] sm:$0xff]  ;;  %v2915_v2 = vld [vmem:[#allocation28_spill] sm:$0xff] }
 0x225   : > { %1327 = vst [vmem:[%s2837_s2 + $0x168] sm:$0xff] %v1263_v42  ;;  %vm1138_vm3 = vcmp.ge.f32.partialorder %v1074_v48, 0.0  ;;  %v1202_v14 = vmul.f32 0.01, %v1074_v48  ;;  %vm1139_vm4 = vcmp.ge.f32.partialorder %v1075_v55, 0.0  ;;  %v1076_v50 = vmul.f32 %v2440_v18, %v1010_v20 }
 0x226   : > { %1328 = vst [vmem:[%s2837_s2 + $0x170] sm:$0xff] %v1264_v46  ;;  %v1265_v52 = vsel %vm1137_vm2, %v1073_v44, %v1201_v37  ;;  %v1203_v54 = vmul.f32 0.01, %v1075_v55  ;;  %v1011_v34 = vsub.f32 %v1889_v56, %v2438_v43  ;;  %v1012_v30 = vsub.f32 %v1897_v60, %v2438_v43 }
 0x227   : > { %1329 = vst [vmem:[%s2837_s2 + $0x178] sm:$0xff] %v1265_v52  ;;  %v1266_v36 = vsel %vm1138_vm3, %v1074_v48, %v1202_v14  ;;  %vm1140_vm5 = vcmp.ge.f32.partialorder %v1076_v50, 0.0  ;;  %v1204_v22 = vmul.f32 0.01, %v1076_v50  ;;  %v1013_v59 = vsub.f32 %v1905_v0, %v2438_v43  ;;  %v2907_v0 = vld [vmem:[#allocation12_spill] sm:$0xff] }
 0x228   : > { %1330 = vst [vmem:[%s2837_s2 + $0x180] sm:$0xff] %v1266_v36  ;;  %v1267_v58 = vsel %vm1139_vm4, %v1075_v55, %v1203_v54  ;;  %v1077_v56 = vmul.f32 %v2440_v18, %v1011_v34  ;;  %v1078_v63 = vmul.f32 %v2440_v18, %v1012_v30  ;;  %v1014_v60 = vsub.f32 %v1913_v4, %v2438_v43 }
 0x229   : > { %1331 = vst [vmem:[%s2837_s2 + $0x188] sm:$0xff] %v1267_v58  ;;  %v1268_v3 = vsel %vm1140_vm5, %v1076_v50, %v1204_v22  ;;  %v1079_v9 = vmul.f32 %v2440_v18, %v1013_v59  ;;  %v1015_v7 = vsub.f32 %v2907_v0, %v2438_v43  ;;  %v1016_v26 = vsub.f32 %v2908_v13, %v2438_v43 }
 0x22a   : > { %1332 = vst [vmem:[%s2837_s2 + $0x190] sm:$0xff] %v1268_v3  ;;  %vm1141_vm6 = vcmp.ge.f32.partialorder %v1077_v56, 0.0  ;;  %v1205_v32 = vmul.f32 0.01, %v1077_v56  ;;  %vm1142_vm7 = vcmp.ge.f32.partialorder %v1078_v63, 0.0  ;;  %v1080_v4 = vmul.f32 %v2440_v18, %v1014_v60 }
 0x22b   : > { %v1206_v17 = vmul.f32 0.01, %v1078_v63  ;;  %vm1143_vm8 = vcmp.ge.f32.partialorder %v1079_v9, 0.0  ;;  %v1207_v21 = vmul.f32 0.01, %v1079_v9  ;;  %v1081_v11 = vmul.f32 %v2440_v18, %v1015_v7 }
 0x22c   : > { %v1269_v25 = vsel %vm1141_vm6, %v1077_v56, %v1205_v32  ;;  %vm1144_vm9 = vcmp.ge.f32.partialorder %v1080_v4, 0.0  ;;  %v1208_v53 = vmul.f32 0.01, %v1080_v4  ;;  %v1082_v40 = vmul.f32 %v2440_v18, %v1016_v26 }
 0x22d   : > { %1333 = vst [vmem:[%s2837_s2 + $0x198] sm:$0xff] %v1269_v25  ;;  %v1270_v15 = vsel %vm1142_vm7, %v1078_v63, %v1206_v17  ;;  %v1271_v29 = vsel %vm1143_vm8, %v1079_v9, %v1207_v21  ;;  %vm1145_vm10 = vcmp.ge.f32.partialorder %v1081_v11, 0.0  ;;  %v1209_v57 = vmul.f32 0.01, %v1081_v11 }
 0x22e   : > { %1334 = vst [vmem:[%s2837_s2 + $0x1a0] sm:$0xff] %v1270_v15  ;;  %v1272_v61 = vsel %vm1144_vm9, %v1080_v4, %v1208_v53  ;;  %vm1146_vm11 = vcmp.ge.f32.partialorder %v1082_v40, 0.0  ;;  %v1210_v12 = vmul.f32 0.01, %v1082_v40  ;;  %v1017_v33 = vsub.f32 %v2909_v1, %v2438_v43 }
 0x22f   : > { %1335 = vst [vmem:[%s2837_s2 + $0x1a8] sm:$0xff] %v1271_v29  ;;  %v1273_v5 = vsel %vm1145_vm10, %v1081_v11, %v1209_v57  ;;  %v1018_v23 = vsub.f32 %v2910_v19, %v2438_v43  ;;  %v1019_v24 = vsub.f32 %v2911_v16, %v2438_v43  ;;  %v1020_v8 = vsub.f32 %v2912_v6, %v2438_v43 }
 0x230   : > { %1336 = vst [vmem:[%s2837_s2 + $0x1b0] sm:$0xff] %v1272_v61  ;;  %v1274_v38 = vsel %vm1146_vm11, %v1082_v40, %v1210_v12  ;;  %v1083_v10 = vmul.f32 %v2440_v18, %v1017_v33  ;;  %v1021_v31 = vsub.f32 %v2913_v27, %v2438_v43  ;;  %v1022_v35 = vsub.f32 %v2914_v45, %v2438_v43 }
 0x231   : > { %1337 = vst [vmem:[%s2837_s2 + $0x1b8] sm:$0xff] %v1273_v5  ;;  %v1084_v47 = vmul.f32 %v2440_v18, %v1018_v23  ;;  %v1085_v51 = vmul.f32 %v2440_v18, %v1019_v24  ;;  %v1086_v62 = vmul.f32 %v2440_v18, %v1020_v8  ;;  %v1023_v41 = vsub.f32 %v2915_v2, %v2438_v43 }
 0x232   : > { %1338 = vst [vmem:[%s2837_s2 + $0x1c0] sm:$0xff] %v1274_v38  ;;  %vm1147_vm12 = vcmp.ge.f32.partialorder %v1083_v10, 0.0  ;;  %v1211_v49 = vmul.f32 0.01, %v1083_v10  ;;  %v1087_v39 = vmul.f32 %v2440_v18, %v1021_v31  ;;  %v1088_v44 = vmul.f32 %v2440_v18, %v1022_v35 }
 0x233   : > { %vm1148_vm13 = vcmp.ge.f32.partialorder %v1084_v47, 0.0  ;;  %v1212_v28 = vmul.f32 0.01, %v1084_v47  ;;  %vm1149_vm14 = vcmp.ge.f32.partialorder %v1085_v51, 0.0  ;;  %v1213_v48 = vmul.f32 0.01, %v1085_v51 }
 0x234   : > { %v1275_v55 = vsel %vm1147_vm12, %v1083_v10, %v1211_v49  ;;  %vm1150_vm15 = vcmp.ge.f32.partialorder %v1086_v62, 0.0  ;;  %v1214_v20 = vmul.f32 0.01, %v1086_v62  ;;  %vm1151_vm0 = vcmp.ge.f32.partialorder %v1087_v39, 0.0 }
 0x235   : > { %1339 = vst [vmem:[%s2837_s2 + $0x1c8] sm:$0xff] %v1275_v55  ;;  %v1276_v43 = vsel %vm1148_vm13, %v1084_v47, %v1212_v28  ;;  %v1277_v42 = vsel %vm1149_vm14, %v1085_v51, %v1213_v48  ;;  %v1215_v46 = vmul.f32 0.01, %v1087_v39  ;;  %vm1152_vm1 = vcmp.ge.f32.partialorder %v1088_v44, 0.0 }
 0x236   : > { %1340 = vst [vmem:[%s2837_s2 + $0x1d0] sm:$0xff] %v1276_v43  ;;  %v1278_v37 = vsel %vm1150_vm15, %v1086_v62, %v1214_v20  ;;  %v1216_v14 = vmul.f32 0.01, %v1088_v44  ;;  %v1089_v50 = vmul.f32 %v2440_v18, %v1023_v41 }
 0x237   : > { %1341 = vst [vmem:[%s2837_s2 + $0x1d8] sm:$0xff] %v1277_v42  ;;  %v1279_v52 = vsel %vm1151_vm0, %v1087_v39, %v1215_v46 }
 0x238   : > { %1342 = vst [vmem:[%s2837_s2 + $0x1e0] sm:$0xff] %v1278_v37  ;;  %v1280_v54 = vsel %vm1152_vm1, %v1088_v44, %v1216_v14  ;;  %vm1153_vm2 = vcmp.ge.f32.partialorder %v1089_v50, 0.0  ;;  %v1217_v34 = vmul.f32 0.01, %v1089_v50 }
 0x239   : > { %1343 = vst [vmem:[%s2837_s2 + $0x1e8] sm:$0xff] %v1279_v52 }
 0x23a   : > { %1344 = vst [vmem:[%s2837_s2 + $0x1f0] sm:$0xff] %v1280_v54  ;;  %v1281_v18 = vsel %vm1153_vm2, %v1089_v50, %v1217_v34 }
 0x23b   : > { %1345 = vst [vmem:[%s2837_s2 + $0x1f8] sm:$0xff] %v1281_v18 }
 0x23c PF: > { %s12_s11 = sadd.s32 1, %s1700_s11   ;;  %s2916_s9 = smov %s1696_s10 }
 0x23d   : > { %p9_p8 = scmp.ge.s32.totalorder %s12_s11, 4   ;;  %s2917_s10 = smov %s2919_s12 }
 0x23f   :  { %11 = sbr.rel (!%p9_p8) target bundleno = 2 (0x2), region = 74 }

// kernel: discrim_block_forward.3
= control target key start
LH: loop header
LB: loop body
LE: loop exit
PB: predicated region body
PF: predicated region fallthrough
CT: control target
= control target key end

     0   :  { %s806_s9 = smov 0   ;;  %s808_s10 = smov 0   ;;  %s1131_s0 = inlined_call_operand.vmem [shape: bf16[128,128], index: 0, kind: input, shape index: {}]   ;;  %s1132_s1 = inlined_call_operand.vmem [shape: bf16[128,128], index: 1, kind: input, shape index: {}]   ;;  %s1133_s2 = inlined_call_operand.vmem [shape: f32[128,128], index: 2, kind: output, shape index: {}]  }
   0x1   :  { %s810_s11 = smov 0  }
   0x2 LB: > { %s24_s12 = sadd.s32 1, %s784_s10  ;;  %p622_p0 = scmp.ge.s32.totalorder %s788_s11, 1  ;;  %s788_s11 = sphi %s810_s11, %s12_s11   ;;  %s784_s10 = sphi %s808_s10, %s1135_s10   ;;  %s780_s9 = sphi %s806_s9, %s1134_s9  }
   0x3   : > { %p26_p1 = scmp.ge.s32.totalorder %s24_s12, 2  ;;  %p125_p2 = scmp.lt.s32.totalorder %s788_s11, 3 }
   0x5   : > { %s1137_s12 = smov (%p26_p1, %s24_s12), 0  ;;  %p126_p3 = pnand %p622_p0, %p125_p2 }
   0x6   : > { %p159_p4 = scmp.eq.s32.totalorder (!%p126_p3), %s780_s9, 0 }
   0x7   : > { %129 = sbr.rel (%p126_p3) target bundleno = 319 (0x13f), region = 28 }
   0xc   : > { %164 = sbr.rel (!%p159_p4) target bundleno = 17 (0x11), region = 32  ;;  %v790_v0 = vmov (%p159_p4), 0.0  }
   0xd   : > { %165 = vst [vmem:[#allocation2] sm:$0x1] (%p159_p4), %v790_v0 }
   0xe   : > { %166 = vst [vmem:[#allocation3] sm:$0x1] (%p159_p4), %v790_v0 }
  0x11 PF: > { %v711_v1 = vld [vmem:[%s1132_s1 + $0x38] sm:$0xff]  ;;  %v710_v2 = vld [vmem:[%s1132_s1 + $0x30] sm:$0xff]  ;;  %v709_v3 = vld [vmem:[%s1132_s1 + $0x28] sm:$0xff]  ;;  %p688_p5 = scmp.ne.s32.totalorder %s780_s9, 0 }
  0x12   : > { %295 = vmatpush.bf16.msra.mxu0 %v711_v1  ;;  %713 = vmatpush.bf16.msra.mxu1 %v711_v1  ;;  %v708_v4 = vld [vmem:[%s1132_s1 + $0x20] sm:$0xff]  ;;  %v707_v5 = vld [vmem:[%s1132_s1 + $0x18] sm:$0xff]  ;;  %v706_v6 = vld [vmem:[%s1132_s1 + $0x10] sm:$0xff] }
  0x13   : > { %714 = vmatpush.bf16.msra.mxu2 %v711_v1  ;;  %715 = vmatpush.bf16.msra.mxu3 %v711_v1  ;;  %v705_v7 = vld [vmem:[%s1132_s1 + $0x8] sm:$0xff]  ;;  %v704_v8 = vld [vmem:[%s1132_s1] sm:$0xff]  ;;  %v698_v10 = vld [vmem:[%s1131_s0 + $0x10] sm:$0xff] }
  0x14   : > { %v696_v9 = vld [vmem:[%s1131_s0] sm:$0xff]  ;;  %v702_v12 = vld [vmem:[%s1131_s0 + $0x30] sm:$0xff]  ;;  %v697_v13 = vld [vmem:[%s1131_s0 + $0x8] sm:$0xff] }
  0x15   : > { %v700_v11 = vld [vmem:[%s1131_s0 + $0x20] sm:$0xff]  ;;  %v699_v14 = vld [vmem:[%s1131_s0 + $0x18] sm:$0xff]  ;;  %v701_v15 = vld [vmem:[%s1131_s0 + $0x28] sm:$0xff] }
  0x16   : > { %296 = vmatpush.bf16.msra.mxu0 %v710_v2  ;;  %716 = vmatpush.bf16.msra.mxu1 %v710_v2  ;;  %v703_v16 = vld [vmem:[%s1131_s0 + $0x38] sm:$0xff] }
  0x17   : > { %717 = vmatpush.bf16.msra.mxu2 %v710_v2  ;;  %718 = vmatpush.bf16.msra.mxu3 %v710_v2 }
  0x1a   : > { %297 = vmatpush.bf16.msra.mxu0 %v709_v3  ;;  %719 = vmatpush.bf16.msra.mxu1 %v709_v3 }
  0x1b   : > { %720 = vmatpush.bf16.msra.mxu2 %v709_v3  ;;  %721 = vmatpush.bf16.msra.mxu3 %v709_v3 }
  0x1e   : > { %298 = vmatpush.bf16.msra.mxu0 %v708_v4  ;;  %722 = vmatpush.bf16.msra.mxu1 %v708_v4 }
  0x1f   : > { %723 = vmatpush.bf16.msra.mxu2 %v708_v4  ;;  %724 = vmatpush.bf16.msra.mxu3 %v708_v4 }
  0x22   : > { %299 = vmatpush.bf16.msra.mxu0 %v707_v5  ;;  %725 = vmatpush.bf16.msra.mxu1 %v707_v5 }
  0x23   : > { %726 = vmatpush.bf16.msra.mxu2 %v707_v5  ;;  %727 = vmatpush.bf16.msra.mxu3 %v707_v5 }
  0x26   : > { %300 = vmatpush.bf16.msra.mxu0 %v706_v6  ;;  %728 = vmatpush.bf16.msra.mxu1 %v706_v6 }
  0x27   : > { %729 = vmatpush.bf16.msra.mxu2 %v706_v6  ;;  %730 = vmatpush.bf16.msra.mxu3 %v706_v6 }
  0x2a   : > { %301 = vmatpush.bf16.msra.mxu0 %v705_v7  ;;  %731 = vmatpush.bf16.msra.mxu1 %v705_v7 }
  0x2b   : > { %732 = vmatpush.bf16.msra.mxu2 %v705_v7  ;;  %733 = vmatpush.bf16.msra.mxu3 %v705_v7 }
  0x2e   : > { %302 = vmatpush.bf16.msra.mxu0 %v704_v8  ;;  %734 = vmatpush.bf16.msra.mxu1 %v704_v8 }
  0x2f   : > { %735 = vmatpush.bf16.msra.mxu2 %v704_v8  ;;  %736 = vmatpush.bf16.msra.mxu3 %v704_v8 }
  0x31   : > { %303 = vmatmul.bf16.vlgmr.msra.gmra.mxu0 %v696_v9  ;;  %313 = vmatmul.bf16.vlgmr.msra.gmra.mxu1 %v698_v10 }
  0x32   : > { %323 = vmatmul.bf16.vlgmr.msra.gmra.mxu2 %v700_v11  ;;  %333 = vmatmul.bf16.vlgmr.msra.gmra.mxu3 %v702_v12 }
  0x41   : > { %308 = vmatmul.bf16.gmra.mxu0 %v697_v13  ;;  %318 = vmatmul.bf16.gmra.mxu1 %v699_v14 }
  0x42   : > { %328 = vmatmul.bf16.gmra.mxu2 %v701_v15  ;;  %338 = vmatmul.bf16.gmra.mxu3 %v703_v16 }
  0xae   : > { %v875_v17 = vpop.f32.mrf.mxu0  ;;  %v877_v18 = vpop.f32.mrf.mxu1 }
  0xb5   : > { %v879_v19 = vpop.f32.mrf.mxu2  ;;  %v881_v20 = vpop.f32.mrf.mxu3 }
  0xb6   : > { %v883_v21 = vpop.f32.mrf.mxu0  ;;  %v885_v22 = vpop.f32.mrf.mxu1 }
  0xbd   : > { %v887_v23 = vpop.f32.mrf.mxu2  ;;  %v889_v24 = vpop.f32.mrf.mxu3 }
  0xbe   : > { %v891_v25 = vpop.f32.mrf.mxu0  ;;  %v893_v26 = vpop.f32.mrf.mxu1 }
  0xc5   : > { %v895_v27 = vpop.f32.mrf.mxu2  ;;  %v897_v28 = vpop.f32.mrf.mxu3 }
  0xc6   : > { %v899_v29 = vpop.f32.mrf.mxu0  ;;  %v901_v30 = vpop.f32.mrf.mxu1 }
  0xc9   : > { %346 = sbr.rel (%p688_p5) target bundleno = 253 (0xfd), region = 36 }
  0xcd   : > { %v903_v31 = vpop.f32.mrf.mxu2  ;;  %v905_v32 = vpop.f32.mrf.mxu3 }
  0xce   : > { %v348_v33 = vadd.f32 %v883_v21, %v875_v17  ;;  %v372_v34 = vmul.f32 %v875_v17, %v875_v17  ;;  %v373_v35 = vmul.f32 %v883_v21, %v883_v21  ;;  %411 = vst [vmem:[%s1133_s2] sm:$0xff] %v875_v17  ;;  %v374_v37 = vmul.f32 %v891_v25, %v891_v25 }
  0xcf   : > { %412 = vst [vmem:[%s1133_s2 + $0x8] sm:$0xff] %v883_v21  ;;  %v375_v39 = vmul.f32 %v899_v29, %v899_v29  ;;  %v376_v42 = vmul.f32 %v877_v18, %v877_v18  ;;  %v377_v45 = vmul.f32 %v885_v22, %v885_v22  ;;  %v378_v48 = vmul.f32 %v893_v26, %v893_v26 }
  0xd0   : > { %v349_v36 = vadd.f32 %v348_v33, %v891_v25  ;;  %413 = vst [vmem:[%s1133_s2 + $0x10] sm:$0xff] %v891_v25  ;;  %v388_v40 = vadd.f32 %v373_v35, %v372_v34  ;;  %v379_v51 = vmul.f32 %v901_v30, %v901_v30  ;;  %v380_v54 = vmul.f32 %v879_v19, %v879_v19 }
  0xd1   : > { %414 = vst [vmem:[%s1133_s2 + $0x18] sm:$0xff] %v899_v29  ;;  %v381_v57 = vmul.f32 %v887_v23, %v887_v23  ;;  %v382_v60 = vmul.f32 %v895_v27, %v895_v27  ;;  %v383_v63 = vmul.f32 %v903_v31, %v903_v31  ;;  %v384_v2 = vmul.f32 %v881_v20, %v881_v20 }
  0xd2   : > { %v350_v38 = vadd.f32 %v349_v36, %v899_v29  ;;  %415 = vst [vmem:[%s1133_s2 + $0x20] sm:$0xff] %v877_v18  ;;  %v389_v43 = vadd.f32 %v388_v40, %v374_v37  ;;  %v385_v5 = vmul.f32 %v889_v24, %v889_v24  ;;  %v386_v8 = vmul.f32 %v897_v28, %v897_v28 }
  0xd3   : > { %416 = vst [vmem:[%s1133_s2 + $0x28] sm:$0xff] %v885_v22  ;;  %v387_v11 = vmul.f32 %v905_v32, %v905_v32 }
  0xd4   : > { %v351_v41 = vadd.f32 %v350_v38, %v877_v18  ;;  %417 = vst [vmem:[%s1133_s2 + $0x30] sm:$0xff] %v893_v26  ;;  %v390_v46 = vadd.f32 %v389_v43, %v375_v39  ;;  %v347_v39 = vld [vmem:[#allocation2] sm:$0x1] }
  0xd5   : > { %418 = vst [vmem:[%s1133_s2 + $0x38] sm:$0xff] %v901_v30 }
  0xd6   : > { %v352_v44 = vadd.f32 %v351_v41, %v885_v22  ;;  %419 = vst [vmem:[%s1133_s2 + $0x40] sm:$0xff] %v879_v19  ;;  %v391_v49 = vadd.f32 %v390_v46, %v376_v42 }
  0xd7   : > { %420 = vst [vmem:[%s1133_s2 + $0x48] sm:$0xff] %v887_v23 }
  0xd8   : > { %v353_v47 = vadd.f32 %v352_v44, %v893_v26  ;;  %421 = vst [vmem:[%s1133_s2 + $0x50] sm:$0xff] %v895_v27  ;;  %v392_v52 = vadd.f32 %v391_v49, %v377_v45  ;;  %v371_v44 = vld [vmem:[#allocation3] sm:$0x1] }
  0xd9   : > { %422 = vst [vmem:[%s1133_s2 + $0x58] sm:$0xff] %v903_v31 }
  0xda   : > { %v354_v50 = vadd.f32 %v353_v47, %v901_v30  ;;  %423 = vst [vmem:[%s1133_s2 + $0x60] sm:$0xff] %v881_v20  ;;  %v393_v55 = vadd.f32 %v392_v52, %v378_v48 }
  0xdb   : > { %424 = vst [vmem:[%s1133_s2 + $0x68] sm:$0xff] %v889_v24 }
  0xdc   : > { %v355_v53 = vadd.f32 %v354_v50, %v879_v19  ;;  %425 = vst [vmem:[%s1133_s2 + $0x70] sm:$0xff] %v897_v28  ;;  %v394_v58 = vadd.f32 %v393_v55, %v379_v51 }
  0xdd   : > { %426 = vst [vmem:[%s1133_s2 + $0x78] sm:$0xff] %v905_v32 }
  0xde   : > { %v356_v56 = vadd.f32 %v355_v53, %v887_v23  ;;  %v395_v61 = vadd.f32 %v394_v58, %v380_v54 }
  0xe0   : > { %v357_v59 = vadd.f32 %v356_v56, %v895_v27  ;;  %v396_v0 = vadd.f32 %v395_v61, %v381_v57 }
  0xe2   : > { %v358_v62 = vadd.f32 %v357_v59, %v903_v31  ;;  %v397_v3 = vadd.f32 %v396_v0, %v382_v60 }
  0xe4   : > { %v359_v1 = vadd.f32 %v358_v62, %v881_v20  ;;  %v398_v6 = vadd.f32 %v397_v3, %v383_v63 }
  0xe6   : > { %v360_v4 = vadd.f32 %v359_v1, %v889_v24  ;;  %v399_v9 = vadd.f32 %v398_v6, %v384_v2 }
  0xe8   : > { %v361_v7 = vadd.f32 %v360_v4, %v897_v28  ;;  %v400_v12 = vadd.f32 %v399_v9, %v385_v5 }
  0xea   : > { %v362_v10 = vadd.f32 %v361_v7, %v905_v32  ;;  %v401_v14 = vadd.f32 %v400_v12, %v386_v8 }
  0xec   : > { %v363_v13 = vrot.slane %v362_v10, 4  ;;  %v402_v16 = vadd.f32 %v401_v14, %v387_v11 }
  0xee   : > { %v364_v15 = vadd.f32 %v363_v13, %v362_v10  ;;  %v403_v34 = vrot.slane %v402_v16, 4 }
  0xf0   : > { %v365_v33 = vrot.slane %v364_v15, 2  ;;  %v404_v36 = vadd.f32 %v403_v34, %v402_v16 }
  0xf2   : > { %v366_v35 = vadd.f32 %v365_v33, %v364_v15  ;;  %v405_v38 = vrot.slane %v404_v36, 2 }
  0xf4   : > { %v367_v37 = vrot.slane %v366_v35, 1  ;;  %v406_v41 = vadd.f32 %v405_v38, %v404_v36 }
  0xf6   : > { %v368_v40 = vadd.f32 %v367_v37, %v366_v35  ;;  %v407_v43 = vrot.slane %v406_v41, 1 }
  0xf8   : > { %v369_v42 = vadd.f32 %v368_v40, %v347_v39  ;;  %v408_v45 = vadd.f32 %v407_v43, %v406_v41 }
  0xfa   : > { %370 = vst [vmem:[#allocation2] sm:$0x1] %v369_v42  ;;  %v409_v46 = vadd.f32 %v408_v45, %v371_v44 }
  0xfc   : > { %410 = vst [vmem:[#allocation3] sm:$0x1] %v409_v46 }
  0xfd PF: > { %p427_p6 = scmp.eq.s32.totalorder %s780_s9, 1 }
  0xff   : > { %431 = sbr.rel (!%p427_p6) target bundleno = 285 (0x11d), region = 40 }
 0x101   : > { %v432_v47 = vld [vmem:[#allocation2] sm:$0x1] (%p427_p6) }
 0x102   : > { %v433_v49 = vmul.f32 (%p427_p6), 0.0078125, %v432_v47 }
 0x103   : > { %v434_v48 = vld [vmem:[#allocation3] sm:$0x1] (%p427_p6) }
 0x104   : > { %v435_v50 = vmul.f32 0.0078125, %v434_v48  ;;  %v436_v51 = vmul.f32 %v433_v49, %v433_v49  ;;  %438 = vst [vmem:[#allocation4] sm:$0x1] %v433_v49 }
 0x106   : > { %v437_v52 = vsub.f32 %v435_v50, %v436_v51 }
 0x108   : > { %v439_v53 = vadd.f32 1e-05, %v437_v52 }
 0x10a   : > { %762 = vrsqrt.f32 %v439_v53  ;;  %vm446_vm0 = vweird.f32 %v439_v53 }
 0x110   : > { %v763_v54 = vpop.eup %762 }
 0x111   : > { %v441_v55 = vmul.f32 %v763_v54, %v439_v53  ;;  %vm447_vm1 = vweird.f32 %v763_v54 }
 0x112   : > { %vm448_vm2 = vmor %vm446_vm0, %vm447_vm1 }
 0x113   : > { %v442_v56 = vmul.f32 %v763_v54, %v441_v55 }
 0x115   : > { %v443_v57 = vmul.f32 0.5, %v442_v56 }
 0x117   : > { %v444_v58 = vsub.f32 1.5, %v443_v57 }
 0x119   : > { %v445_v59 = vmul.f32 %v763_v54, %v444_v58 }
 0x11b   : > { %v449_v60 = vsel %vm448_vm2, %v763_v54, %v445_v59 }
 0x11c   : > { %450 = vst [vmem:[#allocation4 + $0x1] sm:$0x1] %v449_v60 }
 0x11d PF: > { %p690_p7 = scmp.ne.s32.totalorder %s780_s9, 1 }
 0x11f   : > { %453 = sbr.rel (%p690_p7) target bundleno = 319 (0x13f), region = 44 }
 0x124   : > { %v1022_v61 = vld [vmem:[#allocation4] ss:$0 sm:$0xff]  ;;  %v1024_v62 = vld [vmem:[#allocation4 + $0x1] ss:$0 sm:$0xff] }
 0x125   : > { %v456_v63 = vsub.f32 %v875_v17, %v1022_v61  ;;  %v457_v0 = vsub.f32 %v883_v21, %v1022_v61  ;;  %v458_v1 = vsub.f32 %v891_v25, %v1022_v61  ;;  %v459_v2 = vsub.f32 %v899_v29, %v1022_v61 }
 0x126   : > { %v460_v3 = vsub.f32 %v877_v18, %v1022_v61  ;;  %v461_v4 = vsub.f32 %v885_v22, %v1022_v61  ;;  %v462_v5 = vsub.f32 %v893_v26, %v1022_v61  ;;  %v463_v17 = vsub.f32 %v901_v30, %v1022_v61 }
 0x127   : > { %v474_v21 = vmul.f32 %v1024_v62, %v456_v63  ;;  %v475_v6 = vmul.f32 %v1024_v62, %v457_v0  ;;  %v476_v25 = vmul.f32 %v1024_v62, %v458_v1  ;;  %v477_v29 = vmul.f32 %v1024_v62, %v459_v2 }
 0x128   : > { %v478_v7 = vmul.f32 %v1024_v62, %v460_v3  ;;  %v479_v18 = vmul.f32 %v1024_v62, %v461_v4  ;;  %v480_v22 = vmul.f32 %v1024_v62, %v462_v5  ;;  %v481_v8 = vmul.f32 %v1024_v62, %v463_v17 }
 0x129   : > { %vm490_vm3 = vcmp.ge.f32.partialorder %v474_v21, 0.0  ;;  %v506_v26 = vmul.f32 0.01, %v474_v21  ;;  %vm491_vm4 = vcmp.ge.f32.partialorder %v475_v6, 0.0  ;;  %v507_v30 = vmul.f32 0.01, %v475_v6 }
 0x12a   : > { %vm492_vm5 = vcmp.ge.f32.partialorder %v476_v25, 0.0  ;;  %v508_v9 = vmul.f32 0.01, %v476_v25  ;;  %vm493_vm6 = vcmp.ge.f32.partialorder %v477_v29, 0.0  ;;  %v509_v10 = vmul.f32 0.01, %v477_v29 }
 0x12b   : > { %v522_v11 = vsel %vm490_vm3, %v474_v21, %v506_v26  ;;  %v523_v12 = vsel %vm491_vm4, %v475_v6, %v507_v30  ;;  %vm494_vm7 = vcmp.ge.f32.partialorder %v478_v7, 0.0  ;;  %v510_v13 = vmul.f32 0.01, %v478_v7 }
 0x12c   : > { %538 = vst [vmem:[%s1133_s2] sm:$0xff] %v522_v11  ;;  %v524_v14 = vsel %vm492_vm5, %v476_v25, %v508_v9  ;;  %v525_v15 = vsel %vm493_vm6, %v477_v29, %v509_v10  ;;  %vm495_vm8 = vcmp.ge.f32.partialorder %v479_v18, 0.0  ;;  %v511_v16 = vmul.f32 0.01, %v479_v18 }
 0x12d   : > { %539 = vst [vmem:[%s1133_s2 + $0x8] sm:$0xff] %v523_v12  ;;  %v526_v33 = vsel %vm494_vm7, %v478_v7, %v510_v13  ;;  %vm496_vm9 = vcmp.ge.f32.partialorder %v480_v22, 0.0  ;;  %v512_v34 = vmul.f32 0.01, %v480_v22  ;;  %vm497_vm10 = vcmp.ge.f32.partialorder %v481_v8, 0.0 }
 0x12e   : > { %540 = vst [vmem:[%s1133_s2 + $0x10] sm:$0xff] %v524_v14  ;;  %v527_v35 = vsel %vm495_vm8, %v479_v18, %v511_v16  ;;  %v513_v36 = vmul.f32 0.01, %v481_v8  ;;  %v464_v37 = vsub.f32 %v879_v19, %v1022_v61  ;;  %v465_v38 = vsub.f32 %v887_v23, %v1022_v61 }
 0x12f   : > { %541 = vst [vmem:[%s1133_s2 + $0x18] sm:$0xff] %v525_v15  ;;  %v528_v39 = vsel %vm496_vm9, %v480_v22, %v512_v34  ;;  %v466_v40 = vsub.f32 %v895_v27, %v1022_v61  ;;  %v467_v41 = vsub.f32 %v903_v31, %v1022_v61  ;;  %v468_v42 = vsub.f32 %v881_v20, %v1022_v61 }
 0x130   : > { %542 = vst [vmem:[%s1133_s2 + $0x20] sm:$0xff] %v526_v33  ;;  %v529_v19 = vsel %vm497_vm10, %v481_v8, %v513_v36  ;;  %v482_v23 = vmul.f32 %v1024_v62, %v464_v37  ;;  %v483_v43 = vmul.f32 %v1024_v62, %v465_v38  ;;  %v469_v44 = vsub.f32 %v889_v24, %v1022_v61 }
 0x131   : > { %543 = vst [vmem:[%s1133_s2 + $0x28] sm:$0xff] %v527_v35  ;;  %v484_v27 = vmul.f32 %v1024_v62, %v466_v40  ;;  %v485_v20 = vmul.f32 %v1024_v62, %v467_v41  ;;  %v486_v31 = vmul.f32 %v1024_v62, %v468_v42  ;;  %v470_v45 = vsub.f32 %v897_v28, %v1022_v61 }
 0x132   : > { %544 = vst [vmem:[%s1133_s2 + $0x30] sm:$0xff] %v528_v39  ;;  %vm498_vm11 = vcmp.ge.f32.partialorder %v482_v23, 0.0  ;;  %v514_v46 = vmul.f32 0.01, %v482_v23  ;;  %vm499_vm12 = vcmp.ge.f32.partialorder %v483_v43, 0.0  ;;  %v487_v24 = vmul.f32 %v1024_v62, %v469_v44 }
 0x133   : > { %545 = vst [vmem:[%s1133_s2 + $0x38] sm:$0xff] %v529_v19  ;;  %v515_v47 = vmul.f32 0.01, %v483_v43  ;;  %vm500_vm13 = vcmp.ge.f32.partialorder %v484_v27, 0.0  ;;  %v516_v48 = vmul.f32 0.01, %v484_v27  ;;  %v488_v49 = vmul.f32 %v1024_v62, %v470_v45 }
 0x134   : > { %v530_v50 = vsel %vm498_vm11, %v482_v23, %v514_v46  ;;  %vm501_vm14 = vcmp.ge.f32.partialorder %v485_v20, 0.0  ;;  %v517_v28 = vmul.f32 0.01, %v485_v20  ;;  %vm502_vm15 = vcmp.ge.f32.partialorder %v486_v31, 0.0 }
 0x135   : > { %546 = vst [vmem:[%s1133_s2 + $0x40] sm:$0xff] %v530_v50  ;;  %v531_v51 = vsel %vm499_vm12, %v483_v43, %v515_v47  ;;  %v532_v52 = vsel %vm500_vm13, %v484_v27, %v516_v48  ;;  %v518_v53 = vmul.f32 0.01, %v486_v31  ;;  %vm503_vm0 = vcmp.ge.f32.partialorder %v487_v24, 0.0 }
 0x136   : > { %547 = vst [vmem:[%s1133_s2 + $0x48] sm:$0xff] %v531_v51  ;;  %v533_v54 = vsel %vm501_vm14, %v485_v20, %v517_v28  ;;  %v519_v55 = vmul.f32 0.01, %v487_v24  ;;  %vm504_vm1 = vcmp.ge.f32.partialorder %v488_v49, 0.0  ;;  %v520_v56 = vmul.f32 0.01, %v488_v49 }
 0x137   : > { %548 = vst [vmem:[%s1133_s2 + $0x50] sm:$0xff] %v532_v52  ;;  %v534_v57 = vsel %vm502_vm15, %v486_v31, %v518_v53  ;;  %v471_v58 = vsub.f32 %v905_v32, %v1022_v61 }
 0x138   : > { %549 = vst [vmem:[%s1133_s2 + $0x58] sm:$0xff] %v533_v54  ;;  %v535_v59 = vsel %vm503_vm0, %v487_v24, %v519_v55  ;;  %v536_v60 = vsel %vm504_vm1, %v488_v49, %v520_v56 }
 0x139   : > { %550 = vst [vmem:[%s1133_s2 + $0x60] sm:$0xff] %v534_v57  ;;  %v489_v63 = vmul.f32 %v1024_v62, %v471_v58 }
 0x13a   : > { %551 = vst [vmem:[%s1133_s2 + $0x68] sm:$0xff] %v535_v59 }
 0x13b   : > { %552 = vst [vmem:[%s1133_s2 + $0x70] sm:$0xff] %v536_v60  ;;  %vm505_vm2 = vcmp.ge.f32.partialorder %v489_v63, 0.0  ;;  %v521_v32 = vmul.f32 0.01, %v489_v63 }
 0x13d   : > { %v537_v61 = vsel %vm505_vm2, %v489_v63, %v521_v32 }
 0x13e   : > { %553 = vst [vmem:[%s1133_s2 + $0x78] sm:$0xff] %v537_v61 }
 0x13f PF: > { %s12_s11 = sadd.s32 1, %s788_s11   ;;  %s1134_s9 = smov %s784_s10 }
 0x140   : > { %p9_p8 = scmp.ge.s32.totalorder %s12_s11, 4   ;;  %s1135_s10 = smov %s1137_s12 }
 0x142   :  { %11 = sbr.rel (!%p9_p8) target bundleno = 2 (0x2), region = 74 }

</bundles_post_ra>
